<compile_context>
chip_gen: v5e
topology: v5e:2x2
jax: 0.10.0
libtpu: 0.0.40
codegen_flags: <defaults>
</compile_context>

<pallas_src>
import numpy as np
import jax
import jax.numpy as jnp
from jax import lax
from jax.experimental import pallas as pl
from jax.experimental.pallas import tpu as pltpu


_LEAKY_SLOPE = 0.2


# ------------------------------ Pallas kernel -------------------------------

def _make_kernel(tb, in_heights):
    """Builds the fused Discriminator kernel for TB images per grid step."""

    def kernel(x_ref,
               b1_ref, e1_ref, b2_ref, e2_ref, b3_ref, e3_ref, b4_ref, e4_ref,
               hw_ref, hb_ref,
               o_ref,
               a1_ref, a2_ref, a3_ref):

        def conv_block(src_ref, band_ref, eps_ref, h1):
            """Conv2d(3,2,1) + LeakyReLU + Dropout(eval) + BN(eval), TB images.

            src_ref: (tb*h1, W*Cin) unpadded activations, image-major rows,
                     lanes ordered (w, cin).  Returns (tb*h2, h2*Cout).
            """
            h2 = h1 // 2
            m = tb * h2
            # Stride-2 row gathers as strided sublane reads (no MXU gathers).
            even = src_ref[pl.ds(0, m, stride=2), :]     # rows 2j   -> kh=1 tap
            odd = src_ref[pl.ds(1, m, stride=2), :]      # rows 2j+1 -> kh=2 tap
            acc = jnp.dot(even, band_ref[1], preferred_element_type=jnp.float32)
            acc = acc + jnp.dot(odd, band_ref[2],
                                preferred_element_type=jnp.float32)
            if h2 > 1:
                # kh=0 tap needs rows 2j-1: shift `odd` down one output row; the
                # first output row of each image reads the (zero) top pad row.
                top = pltpu.roll(odd, shift=1, axis=0)
                rid = lax.broadcasted_iota(jnp.int32, top.shape, 0)
                top = jnp.where((rid % h2) == 0, 0.0, top)
                acc = acc + jnp.dot(top, band_ref[0],
                                    preferred_element_type=jnp.float32)
            # (h2 == 1: the kh=0 tap always hits the top pad row -> skip it.)
            z = acc + eps_ref[0:1, :]                    # conv bias (BN scale folded)
            z = jnp.where(z > 0, z, _LEAKY_SLOPE * z)    # LeakyReLU(0.2)
            # Dropout2d(0.25): identity in eval mode.
            return z + eps_ref[1:2, :]                   # BatchNorm2d (eval) shift

        # Activation scratch stays 128-lane aligned; full-width unmasked writes.
        a1_ref[...] = conv_block(x_ref, b1_ref, e1_ref, in_heights[0])
        a2_ref[...] = conv_block(a1_ref, b2_ref, e2_ref, in_heights[1])
        a3_ref[...] = conv_block(a2_ref, b3_ref, e3_ref, in_heights[2])
        feat = conv_block(a3_ref, b4_ref, e4_ref, in_heights[3])     # (tb, 128)

        # adv head: Linear(128 -> 1) + Sigmoid, fused into the epilogue.
        logit = jnp.dot(feat, hw_ref[...],
                        preferred_element_type=jnp.float32) + hb_ref[...]
        o_ref[...] = 1.0 / (1.0 + jnp.exp(-logit))

    return kernel


# ------------------------- host-side parameter lowering ----------------------

def _lower_params(params, in_size):
    """Banded conv matrices (W-pad folded in), packed epilogue vectors."""
    bands, epss = [], []
    h = in_size
    for (w, b, scale, shift) in params["blocks"]:
        _, _, cin, cout = w.shape
        h2 = h // 2
        # Fold the eval-mode BN scale into the conv weights / bias.
        # Only valid because scale > 0 (guaranteed by init_params).
        assert float(jnp.min(scale)) > 0.0, "BN scale must be > 0 for folding"
        w_eff = (np.asarray(w, np.float32)
                 * np.asarray(scale, np.float32).reshape(1, 1, 1, cout))

        # band[kh][(2j+kw-1)*Cin + c, j*Cout + o] = w_eff[kh, kw, c, o]
        # Taps that fall outside [0, W) (the pad=1 columns) stay zero.
        band = np.zeros((3, h * cin, h2 * cout), np.float32)
        for kh in range(3):
            for kw in range(3):
                for j in range(h2):
                    win = 2 * j + kw - 1
                    if 0 <= win < h:
                        band[kh, win * cin:(win + 1) * cin,
                             j * cout:(j + 1) * cout] = w_eff[kh, kw]
        bands.append(jnp.asarray(band))

        # Packed epilogue constants tiled to the (Wout*Cout) lane layout.
        epss.append(jnp.stack([jnp.tile(scale * b, h2),
                               jnp.tile(shift, h2)]).astype(jnp.float32))
        h = h2

    head_w = params["head_w"].reshape(-1, 1)              # (128, 1)
    head_b = params["head_b"].reshape(1, 1)
    return bands, epss, head_w, head_b


# ------------------------------- forward pass --------------------------------

def discriminator_forward(img_nchw, params, tb=8):
    n, c, h, w = img_nchw.shape
    assert h == w and h % 16 == 0, "ds_size=1 requires square 16-divisible input"
    assert n % tb == 0 and (tb % 8 == 0 or tb == n), "pick tb | n, tb % 8 == 0"

    # NCHW -> (N*H, W*C): rows = (image, row), lanes = (w, c).  No jnp.pad.
    x = jnp.transpose(img_nchw, (0, 2, 3, 1)).reshape(n * h, w * c)

    bands, epss, head_w, head_b = _lower_params(params, h)
    const_ops = []
    for bd, ep in zip(bands, epss):
        const_ops += [bd, ep]

    def const_spec(arr):
        zeros = (0,) * arr.ndim
        return pl.BlockSpec(arr.shape, lambda i, _z=zeros: _z)  # loaded once

    grid = (n // tb,)
    out = pl.pallas_call(
        _make_kernel(tb, [h, h // 2, h // 4, h // 8]),
        grid=grid,
        out_shape=jax.ShapeDtypeStruct((n, 1), jnp.float32),
        in_specs=[pl.BlockSpec((tb * h, w * c), lambda i: (i, 0))]
                 + [const_spec(a) for a in const_ops]
                 + [const_spec(head_w), const_spec(head_b)],
        out_specs=pl.BlockSpec((tb, 1), lambda i: (i, 0)),
        scratch_shapes=[                       # unpadded activations, 128 lanes
            pltpu.VMEM((tb * (h // 2), (h // 2) * 16), jnp.float32),
            pltpu.VMEM((tb * (h // 4), (h // 4) * 32), jnp.float32),
            pltpu.VMEM((tb * (h // 8), (h // 8) * 64), jnp.float32),
        ],
        compiler_params=pltpu.CompilerParams(
            dimension_semantics=("parallel",),   # v7x: grid split over 2 TCs
            vmem_limit_bytes=32 * 1024 * 1024,   # actual use ~2-3 MB << 64 MiB (v7x)
        ),
    )(x, *const_ops, head_w, head_b)
    return out


# ------------------------- deterministic parameters --------------------------

def init_params(key, channels):
    eps = 0.8                                    # nn.BatchNorm2d(out, 0.8) -> eps=0.8
    cfg = [(channels, 16, False), (16, 32, True), (32, 64, True), (64, 128, True)]
    blocks = []
    for cin, cout, bn in cfg:
        key, kw, kb, kg, kbe, km, kv = jax.random.split(key, 7)
        w = 0.1 * jax.random.normal(kw, (3, 3, cin, cout), dtype=jnp.float32)
        b = 0.1 * jax.random.normal(kb, (cout,), dtype=jnp.float32)
        if bn:
            # gamma > 0 so the BN-scale-into-weights fold is valid.
            gamma = 1.0 + 0.1 * jnp.abs(jax.random.normal(kg, (cout,), dtype=jnp.float32))
            beta = 0.1 * jax.random.normal(kbe, (cout,), dtype=jnp.float32)
            rmean = 0.1 * jax.random.normal(km, (cout,), dtype=jnp.float32)
            rvar = 1.0 + 0.1 * jnp.abs(jax.random.normal(kv, (cout,), dtype=jnp.float32))
            scale = gamma / jnp.sqrt(rvar + eps)
            shift = beta - rmean * scale
        else:
            scale = jnp.ones((cout,), jnp.float32)
            shift = jnp.zeros((cout,), jnp.float32)
        blocks.append((w, b, scale, shift))
    key, kw, kb = jax.random.split(key, 3)
    head_w = 0.1 * jax.random.normal(kw, (128, 1), dtype=jnp.float32)
    head_b = 0.1 * jax.random.normal(kb, (1,), dtype=jnp.float32)
    return {"blocks": blocks, "head_w": head_w, "head_b": head_b}, key


# ------------------------------ pure-JAX reference ---------------------------

def _ref_forward(img_nchw, params):
    x = jnp.transpose(img_nchw, (0, 2, 3, 1))
    for (w, b, scale, shift) in params["blocks"]:
        x = lax.conv_general_dilated(
            x, w, window_strides=(2, 2), padding=((1, 1), (1, 1)),
            dimension_numbers=("NHWC", "HWIO", "NHWC"))
        x = x + b
        x = jnp.where(x > 0, x, _LEAKY_SLOPE * x)
        x = x * scale + shift
    x = x.reshape(x.shape[0], -1)
    z = x @ params["head_w"] + params["head_b"]
    return 1.0 / (1.0 + jnp.exp(-z))


# ----------------------------------- main ------------------------------------

if __name__ == "__main__":
    batch, channels, in_size = 16, 4, 16          # ds_size=1 requires in_size=16
    key = jax.random.PRNGKey(0)
    params, key = init_params(key, channels)
    key, kx = jax.random.split(key)
    img = jax.random.normal(kx, (batch, channels, in_size, in_size), dtype=jnp.float32)

    validity = discriminator_forward(img, params, tb=8)   # grid = 2 (v7x: 1 per TC)
    validity = jax.block_until_ready(validity)

    ref = _ref_forward(img, params)
    assert validity.shape == (batch, 1), validity.shape
    assert jnp.allclose(validity, ref, atol=1e-3, rtol=1e-3), (validity, ref)
    print("KERNEL_OK")
</pallas_src>

<mosaic_0001>
module attributes {stable_mosaic.version = 11 : i64} {
  func.func @kernel(%arg0: i32, %arg1: memref<128x64xf32, #tpu.memory_space<vmem>>, %arg2: memref<3x64x128xf32, #tpu.memory_space<vmem>>, %arg3: memref<2x128xf32, #tpu.memory_space<vmem>>, %arg4: memref<3x128x128xf32, #tpu.memory_space<vmem>>, %arg5: memref<2x128xf32, #tpu.memory_space<vmem>>, %arg6: memref<3x128x128xf32, #tpu.memory_space<vmem>>, %arg7: memref<2x128xf32, #tpu.memory_space<vmem>>, %arg8: memref<3x128x128xf32, #tpu.memory_space<vmem>>, %arg9: memref<2x128xf32, #tpu.memory_space<vmem>>, %arg10: memref<128x1xf32, #tpu.memory_space<vmem>>, %arg11: memref<1x1xf32, #tpu.memory_space<vmem>>, %arg12: memref<8x1xf32, #tpu.memory_space<vmem>>, %arg13: memref<64x128xf32, #tpu.memory_space<vmem>>, %arg14: memref<32x128xf32, #tpu.memory_space<vmem>>, %arg15: memref<16x128xf32, #tpu.memory_space<vmem>>) attributes {dimension_semantics = [#tpu.dimension_semantics<parallel>], iteration_bounds = array<i64: 2>, scalar_prefetch = 0 : i64, scratch_operands = 3 : i64, tpu.core_type = #tpu.core_type<tc>, window_params = [{transform_indices = @transform_0, window_bounds = array<i64: 128, 64>}, {pipeline_mode = #tpu.pipeline_mode<synchronous>, transform_indices = @transform_1, window_bounds = array<i64: 3, 64, 128>}, {pipeline_mode = #tpu.pipeline_mode<synchronous>, transform_indices = @transform_2, window_bounds = array<i64: 2, 128>}, {pipeline_mode = #tpu.pipeline_mode<synchronous>, transform_indices = @transform_3, window_bounds = array<i64: 3, 128, 128>}, {pipeline_mode = #tpu.pipeline_mode<synchronous>, transform_indices = @transform_4, window_bounds = array<i64: 2, 128>}, {pipeline_mode = #tpu.pipeline_mode<synchronous>, transform_indices = @transform_5, window_bounds = array<i64: 3, 128, 128>}, {pipeline_mode = #tpu.pipeline_mode<synchronous>, transform_indices = @transform_6, window_bounds = array<i64: 2, 128>}, {pipeline_mode = #tpu.pipeline_mode<synchronous>, transform_indices = @transform_7, window_bounds = array<i64: 3, 128, 128>}, {pipeline_mode = #tpu.pipeline_mode<synchronous>, transform_indices = @transform_8, window_bounds = array<i64: 2, 128>}, {pipeline_mode = #tpu.pipeline_mode<synchronous>, transform_indices = @transform_9, window_bounds = array<i64: 128, 1>}, {pipeline_mode = #tpu.pipeline_mode<synchronous>, transform_indices = @transform_10, window_bounds = array<i64: 1, 1>}, {transform_indices = @transform_11, window_bounds = array<i64: 8, 1>}]} {
    %c0 = arith.constant 0 : index
    %c0_0 = arith.constant 0 : index
    %0 = tpu.strided_load %arg1[%c0, %c0_0] {strides = array<i32: 2, 1>} : memref<128x64xf32, #tpu.memory_space<vmem>>, vector<64x64xf32>
    %c1 = arith.constant 1 : index
    %c0_1 = arith.constant 0 : index
    %1 = tpu.strided_load %arg1[%c1, %c0_1] {strides = array<i32: 2, 1>} : memref<128x64xf32, #tpu.memory_space<vmem>>, vector<64x64xf32>
    %c1_2 = arith.constant 1 : index
    %c0_3 = arith.constant 0 : index
    %c0_4 = arith.constant 0 : index
    %2 = vector.load %arg2[%c1_2, %c0_3, %c0_4] : memref<3x64x128xf32, #tpu.memory_space<vmem>>, vector<1x64x128xf32>
    %3 = vector.shape_cast %2 : vector<1x64x128xf32> to vector<64x128xf32>
    %cst = arith.constant dense<0.000000e+00> : vector<64x128xf32>
    %4 = tpu.matmul %0, %3, %cst {dimension_numbers = #tpu.dot_dimension_numbers<[1], [0], [0], [1], [0, 0, 1, 1], [], []>} : vector<64x64xf32>, vector<64x128xf32>, vector<64x128xf32> -> vector<64x128xf32>
    %c2 = arith.constant 2 : index
    %c0_5 = arith.constant 0 : index
    %c0_6 = arith.constant 0 : index
    %5 = vector.load %arg2[%c2, %c0_5, %c0_6] : memref<3x64x128xf32, #tpu.memory_space<vmem>>, vector<1x64x128xf32>
    %6 = vector.shape_cast %5 : vector<1x64x128xf32> to vector<64x128xf32>
    %cst_7 = arith.constant dense<0.000000e+00> : vector<64x128xf32>
    %7 = tpu.matmul %1, %6, %cst_7 {dimension_numbers = #tpu.dot_dimension_numbers<[1], [0], [0], [1], [0, 0, 1, 1], [], []>} : vector<64x64xf32>, vector<64x128xf32>, vector<64x128xf32> -> vector<64x128xf32>
    %8 = arith.addf %4, %7 : vector<64x128xf32>
    %c1_i32 = arith.constant 1 : i32
    %9 = tpu.dynamic_rotate %1 by %c1_i32 dim 0 : vector<64x64xf32>, i32 -> vector<64x64xf32>
    %10 = tpu.iota {dimensions = array<i32: 0>} : vector<64x64xi32>
    %c8_i32 = arith.constant 8 : i32
    %c0_i32 = arith.constant 0 : i32
    %11 = arith.cmpi eq, %c8_i32, %c0_i32 : i32
    %c1_i32_8 = arith.constant 1 : i32
    %12 = arith.select %11, %c1_i32_8, %c8_i32 : i32
    %13 = vector.broadcast %12 : i32 to vector<64x64xi32>
    %14 = arith.remsi %10, %13 : vector<64x64xi32>
    %c0_i32_9 = arith.constant 0 : i32
    %15 = vector.broadcast %c0_i32_9 : i32 to vector<64x64xi32>
    %16 = arith.cmpi ne, %14, %15 : vector<64x64xi32>
    %c0_i32_10 = arith.constant 0 : i32
    %17 = vector.broadcast %c0_i32_10 : i32 to vector<64x64xi32>
    %18 = arith.cmpi slt, %14, %17 : vector<64x64xi32>
    %c0_i32_11 = arith.constant 0 : i32
    %19 = arith.cmpi slt, %12, %c0_i32_11 : i32
    %20 = vector.broadcast %19 : i1 to vector<64x64xi1>
    %21 = vector.broadcast %20 : vector<64x64xi1> to vector<64x64xi1>
    %22 = arith.xori %18, %21 : vector<64x64xi1>
    %23 = arith.andi %22, %16 : vector<64x64xi1>
    %24 = vector.broadcast %12 : i32 to vector<64x64xi32>
    %25 = arith.addi %14, %24 : vector<64x64xi32>
    %26 = arith.select %23, %25, %14 : vector<64x64xi1>, vector<64x64xi32>
    %c0_i32_12 = arith.constant 0 : i32
    %27 = vector.broadcast %c0_i32_12 : i32 to vector<64x64xi32>
    %28 = arith.cmpi eq, %26, %27 : vector<64x64xi32>
    %cst_13 = arith.constant 0.000000e+00 : f32
    %29 = vector.broadcast %cst_13 : f32 to vector<64x64xf32>
    %30 = arith.select %28, %29, %9 : vector<64x64xi1>, vector<64x64xf32>
    %c0_14 = arith.constant 0 : index
    %c0_15 = arith.constant 0 : index
    %c0_16 = arith.constant 0 : index
    %31 = vector.load %arg2[%c0_14, %c0_15, %c0_16] : memref<3x64x128xf32, #tpu.memory_space<vmem>>, vector<1x64x128xf32>
    %32 = vector.shape_cast %31 : vector<1x64x128xf32> to vector<64x128xf32>
    %cst_17 = arith.constant dense<0.000000e+00> : vector<64x128xf32>
    %33 = tpu.matmul %30, %32, %cst_17 {dimension_numbers = #tpu.dot_dimension_numbers<[1], [0], [0], [1], [0, 0, 1, 1], [], []>} : vector<64x64xf32>, vector<64x128xf32>, vector<64x128xf32> -> vector<64x128xf32>
    %34 = arith.addf %8, %33 : vector<64x128xf32>
    %c0_18 = arith.constant 0 : index
    %c0_19 = arith.constant 0 : index
    %35 = vector.load %arg3[%c0_18, %c0_19] : memref<2x128xf32, #tpu.memory_space<vmem>>, vector<1x128xf32>
    %36 = vector.broadcast %35 : vector<1x128xf32> to vector<64x128xf32>
    %37 = arith.addf %34, %36 : vector<64x128xf32>
    %cst_20 = arith.constant 0.000000e+00 : f32
    %38 = vector.broadcast %cst_20 : f32 to vector<64x128xf32>
    %39 = arith.cmpf ogt, %37, %38 : vector<64x128xf32>
    %cst_21 = arith.constant 2.000000e-01 : f32
    %40 = vector.broadcast %cst_21 : f32 to vector<64x128xf32>
    %41 = arith.mulf %40, %37 : vector<64x128xf32>
    %42 = arith.select %39, %37, %41 : vector<64x128xi1>, vector<64x128xf32>
    %c1_22 = arith.constant 1 : index
    %c0_23 = arith.constant 0 : index
    %43 = vector.load %arg3[%c1_22, %c0_23] : memref<2x128xf32, #tpu.memory_space<vmem>>, vector<1x128xf32>
    %44 = vector.broadcast %43 : vector<1x128xf32> to vector<64x128xf32>
    %45 = arith.addf %42, %44 : vector<64x128xf32>
    %c0_24 = arith.constant 0 : index
    %c0_25 = arith.constant 0 : index
    %46 = vector.load %arg13[%c0_24, %c0_25] : memref<64x128xf32, #tpu.memory_space<vmem>>, vector<64x128xf32>
    tpu.vector_store %arg13[%c0_24, %c0_25], %45 {strides = array<i32>} : memref<64x128xf32, #tpu.memory_space<vmem>>, vector<64x128xf32>,
    %c0_26 = arith.constant 0 : index
    %c0_27 = arith.constant 0 : index
    %47 = tpu.strided_load %arg13[%c0_26, %c0_27] {strides = array<i32: 2, 1>} : memref<64x128xf32, #tpu.memory_space<vmem>>, vector<32x128xf32>
    %c1_28 = arith.constant 1 : index
    %c0_29 = arith.constant 0 : index
    %48 = tpu.strided_load %arg13[%c1_28, %c0_29] {strides = array<i32: 2, 1>} : memref<64x128xf32, #tpu.memory_space<vmem>>, vector<32x128xf32>
    %c1_30 = arith.constant 1 : index
    %c0_31 = arith.constant 0 : index
    %c0_32 = arith.constant 0 : index
    %49 = vector.load %arg4[%c1_30, %c0_31, %c0_32] : memref<3x128x128xf32, #tpu.memory_space<vmem>>, vector<1x128x128xf32>
    %50 = vector.shape_cast %49 : vector<1x128x128xf32> to vector<128x128xf32>
    %cst_33 = arith.constant dense<0.000000e+00> : vector<32x128xf32>
    %51 = tpu.matmul %47, %50, %cst_33 {dimension_numbers = #tpu.dot_dimension_numbers<[1], [0], [0], [1], [0, 0, 1, 1], [], []>} : vector<32x128xf32>, vector<128x128xf32>, vector<32x128xf32> -> vector<32x128xf32>
    %c2_34 = arith.constant 2 : index
    %c0_35 = arith.constant 0 : index
    %c0_36 = arith.constant 0 : index
    %52 = vector.load %arg4[%c2_34, %c0_35, %c0_36] : memref<3x128x128xf32, #tpu.memory_space<vmem>>, vector<1x128x128xf32>
    %53 = vector.shape_cast %52 : vector<1x128x128xf32> to vector<128x128xf32>
    %cst_37 = arith.constant dense<0.000000e+00> : vector<32x128xf32>
    %54 = tpu.matmul %48, %53, %cst_37 {dimension_numbers = #tpu.dot_dimension_numbers<[1], [0], [0], [1], [0, 0, 1, 1], [], []>} : vector<32x128xf32>, vector<128x128xf32>, vector<32x128xf32> -> vector<32x128xf32>
    %55 = arith.addf %51, %54 : vector<32x128xf32>
    %c1_i32_38 = arith.constant 1 : i32
    %56 = tpu.dynamic_rotate %48 by %c1_i32_38 dim 0 : vector<32x128xf32>, i32 -> vector<32x128xf32>
    %57 = tpu.iota {dimensions = array<i32: 0>} : vector<32x128xi32>
    %c4_i32 = arith.constant 4 : i32
    %c0_i32_39 = arith.constant 0 : i32
    %58 = arith.cmpi eq, %c4_i32, %c0_i32_39 : i32
    %c1_i32_40 = arith.constant 1 : i32
    %59 = arith.select %58, %c1_i32_40, %c4_i32 : i32
    %60 = vector.broadcast %59 : i32 to vector<32x128xi32>
    %61 = arith.remsi %57, %60 : vector<32x128xi32>
    %c0_i32_41 = arith.constant 0 : i32
    %62 = vector.broadcast %c0_i32_41 : i32 to vector<32x128xi32>
    %63 = arith.cmpi ne, %61, %62 : vector<32x128xi32>
    %c0_i32_42 = arith.constant 0 : i32
    %64 = vector.broadcast %c0_i32_42 : i32 to vector<32x128xi32>
    %65 = arith.cmpi slt, %61, %64 : vector<32x128xi32>
    %c0_i32_43 = arith.constant 0 : i32
    %66 = arith.cmpi slt, %59, %c0_i32_43 : i32
    %67 = vector.broadcast %66 : i1 to vector<32x128xi1>
    %68 = vector.broadcast %67 : vector<32x128xi1> to vector<32x128xi1>
    %69 = arith.xori %65, %68 : vector<32x128xi1>
    %70 = arith.andi %69, %63 : vector<32x128xi1>
    %71 = vector.broadcast %59 : i32 to vector<32x128xi32>
    %72 = arith.addi %61, %71 : vector<32x128xi32>
    %73 = arith.select %70, %72, %61 : vector<32x128xi1>, vector<32x128xi32>
    %c0_i32_44 = arith.constant 0 : i32
    %74 = vector.broadcast %c0_i32_44 : i32 to vector<32x128xi32>
    %75 = arith.cmpi eq, %73, %74 : vector<32x128xi32>
    %cst_45 = arith.constant 0.000000e+00 : f32
    %76 = vector.broadcast %cst_45 : f32 to vector<32x128xf32>
    %77 = arith.select %75, %76, %56 : vector<32x128xi1>, vector<32x128xf32>
    %c0_46 = arith.constant 0 : index
    %c0_47 = arith.constant 0 : index
    %c0_48 = arith.constant 0 : index
    %78 = vector.load %arg4[%c0_46, %c0_47, %c0_48] : memref<3x128x128xf32, #tpu.memory_space<vmem>>, vector<1x128x128xf32>
    %79 = vector.shape_cast %78 : vector<1x128x128xf32> to vector<128x128xf32>
    %cst_49 = arith.constant dense<0.000000e+00> : vector<32x128xf32>
    %80 = tpu.matmul %77, %79, %cst_49 {dimension_numbers = #tpu.dot_dimension_numbers<[1], [0], [0], [1], [0, 0, 1, 1], [], []>} : vector<32x128xf32>, vector<128x128xf32>, vector<32x128xf32> -> vector<32x128xf32>
    %81 = arith.addf %55, %80 : vector<32x128xf32>
    %c0_50 = arith.constant 0 : index
    %c0_51 = arith.constant 0 : index
    %82 = vector.load %arg5[%c0_50, %c0_51] : memref<2x128xf32, #tpu.memory_space<vmem>>, vector<1x128xf32>
    %83 = vector.broadcast %82 : vector<1x128xf32> to vector<32x128xf32>
    %84 = arith.addf %81, %83 : vector<32x128xf32>
    %cst_52 = arith.constant 0.000000e+00 : f32
    %85 = vector.broadcast %cst_52 : f32 to vector<32x128xf32>
    %86 = arith.cmpf ogt, %84, %85 : vector<32x128xf32>
    %cst_53 = arith.constant 2.000000e-01 : f32
    %87 = vector.broadcast %cst_53 : f32 to vector<32x128xf32>
    %88 = arith.mulf %87, %84 : vector<32x128xf32>
    %89 = arith.select %86, %84, %88 : vector<32x128xi1>, vector<32x128xf32>
    %c1_54 = arith.constant 1 : index
    %c0_55 = arith.constant 0 : index
    %90 = vector.load %arg5[%c1_54, %c0_55] : memref<2x128xf32, #tpu.memory_space<vmem>>, vector<1x128xf32>
    %91 = vector.broadcast %90 : vector<1x128xf32> to vector<32x128xf32>
    %92 = arith.addf %89, %91 : vector<32x128xf32>
    %c0_56 = arith.constant 0 : index
    %c0_57 = arith.constant 0 : index
    %93 = vector.load %arg14[%c0_56, %c0_57] : memref<32x128xf32, #tpu.memory_space<vmem>>, vector<32x128xf32>
    tpu.vector_store %arg14[%c0_56, %c0_57], %92 {strides = array<i32>} : memref<32x128xf32, #tpu.memory_space<vmem>>, vector<32x128xf32>,
    %c0_58 = arith.constant 0 : index
    %c0_59 = arith.constant 0 : index
    %94 = tpu.strided_load %arg14[%c0_58, %c0_59] {strides = array<i32: 2, 1>} : memref<32x128xf32, #tpu.memory_space<vmem>>, vector<16x128xf32>
    %c1_60 = arith.constant 1 : index
    %c0_61 = arith.constant 0 : index
    %95 = tpu.strided_load %arg14[%c1_60, %c0_61] {strides = array<i32: 2, 1>} : memref<32x128xf32, #tpu.memory_space<vmem>>, vector<16x128xf32>
    %c1_62 = arith.constant 1 : index
    %c0_63 = arith.constant 0 : index
    %c0_64 = arith.constant 0 : index
    %96 = vector.load %arg6[%c1_62, %c0_63, %c0_64] : memref<3x128x128xf32, #tpu.memory_space<vmem>>, vector<1x128x128xf32>
    %97 = vector.shape_cast %96 : vector<1x128x128xf32> to vector<128x128xf32>
    %cst_65 = arith.constant dense<0.000000e+00> : vector<16x128xf32>
    %98 = tpu.matmul %94, %97, %cst_65 {dimension_numbers = #tpu.dot_dimension_numbers<[1], [0], [0], [1], [0, 0, 1, 1], [], []>} : vector<16x128xf32>, vector<128x128xf32>, vector<16x128xf32> -> vector<16x128xf32>
    %c2_66 = arith.constant 2 : index
    %c0_67 = arith.constant 0 : index
    %c0_68 = arith.constant 0 : index
    %99 = vector.load %arg6[%c2_66, %c0_67, %c0_68] : memref<3x128x128xf32, #tpu.memory_space<vmem>>, vector<1x128x128xf32>
    %100 = vector.shape_cast %99 : vector<1x128x128xf32> to vector<128x128xf32>
    %cst_69 = arith.constant dense<0.000000e+00> : vector<16x128xf32>
    %101 = tpu.matmul %95, %100, %cst_69 {dimension_numbers = #tpu.dot_dimension_numbers<[1], [0], [0], [1], [0, 0, 1, 1], [], []>} : vector<16x128xf32>, vector<128x128xf32>, vector<16x128xf32> -> vector<16x128xf32>
    %102 = arith.addf %98, %101 : vector<16x128xf32>
    %c1_i32_70 = arith.constant 1 : i32
    %103 = tpu.dynamic_rotate %95 by %c1_i32_70 dim 0 : vector<16x128xf32>, i32 -> vector<16x128xf32>
    %104 = tpu.iota {dimensions = array<i32: 0>} : vector<16x128xi32>
    %c2_i32 = arith.constant 2 : i32
    %c0_i32_71 = arith.constant 0 : i32
    %105 = arith.cmpi eq, %c2_i32, %c0_i32_71 : i32
    %c1_i32_72 = arith.constant 1 : i32
    %106 = arith.select %105, %c1_i32_72, %c2_i32 : i32
    %107 = vector.broadcast %106 : i32 to vector<16x128xi32>
    %108 = arith.remsi %104, %107 : vector<16x128xi32>
    %c0_i32_73 = arith.constant 0 : i32
    %109 = vector.broadcast %c0_i32_73 : i32 to vector<16x128xi32>
    %110 = arith.cmpi ne, %108, %109 : vector<16x128xi32>
    %c0_i32_74 = arith.constant 0 : i32
    %111 = vector.broadcast %c0_i32_74 : i32 to vector<16x128xi32>
    %112 = arith.cmpi slt, %108, %111 : vector<16x128xi32>
    %c0_i32_75 = arith.constant 0 : i32
    %113 = arith.cmpi slt, %106, %c0_i32_75 : i32
    %114 = vector.broadcast %113 : i1 to vector<16x128xi1>
    %115 = vector.broadcast %114 : vector<16x128xi1> to vector<16x128xi1>
    %116 = arith.xori %112, %115 : vector<16x128xi1>
    %117 = arith.andi %116, %110 : vector<16x128xi1>
    %118 = vector.broadcast %106 : i32 to vector<16x128xi32>
    %119 = arith.addi %108, %118 : vector<16x128xi32>
    %120 = arith.select %117, %119, %108 : vector<16x128xi1>, vector<16x128xi32>
    %c0_i32_76 = arith.constant 0 : i32
    %121 = vector.broadcast %c0_i32_76 : i32 to vector<16x128xi32>
    %122 = arith.cmpi eq, %120, %121 : vector<16x128xi32>
    %cst_77 = arith.constant 0.000000e+00 : f32
    %123 = vector.broadcast %cst_77 : f32 to vector<16x128xf32>
    %124 = arith.select %122, %123, %103 : vector<16x128xi1>, vector<16x128xf32>
    %c0_78 = arith.constant 0 : index
    %c0_79 = arith.constant 0 : index
    %c0_80 = arith.constant 0 : index
    %125 = vector.load %arg6[%c0_78, %c0_79, %c0_80] : memref<3x128x128xf32, #tpu.memory_space<vmem>>, vector<1x128x128xf32>
    %126 = vector.shape_cast %125 : vector<1x128x128xf32> to vector<128x128xf32>
    %cst_81 = arith.constant dense<0.000000e+00> : vector<16x128xf32>
    %127 = tpu.matmul %124, %126, %cst_81 {dimension_numbers = #tpu.dot_dimension_numbers<[1], [0], [0], [1], [0, 0, 1, 1], [], []>} : vector<16x128xf32>, vector<128x128xf32>, vector<16x128xf32> -> vector<16x128xf32>
    %128 = arith.addf %102, %127 : vector<16x128xf32>
    %c0_82 = arith.constant 0 : index
    %c0_83 = arith.constant 0 : index
    %129 = vector.load %arg7[%c0_82, %c0_83] : memref<2x128xf32, #tpu.memory_space<vmem>>, vector<1x128xf32>
    %130 = vector.broadcast %129 : vector<1x128xf32> to vector<16x128xf32>
    %131 = arith.addf %128, %130 : vector<16x128xf32>
    %cst_84 = arith.constant 0.000000e+00 : f32
    %132 = vector.broadcast %cst_84 : f32 to vector<16x128xf32>
    %133 = arith.cmpf ogt, %131, %132 : vector<16x128xf32>
    %cst_85 = arith.constant 2.000000e-01 : f32
    %134 = vector.broadcast %cst_85 : f32 to vector<16x128xf32>
    %135 = arith.mulf %134, %131 : vector<16x128xf32>
    %136 = arith.select %133, %131, %135 : vector<16x128xi1>, vector<16x128xf32>
    %c1_86 = arith.constant 1 : index
    %c0_87 = arith.constant 0 : index
    %137 = vector.load %arg7[%c1_86, %c0_87] : memref<2x128xf32, #tpu.memory_space<vmem>>, vector<1x128xf32>
    %138 = vector.broadcast %137 : vector<1x128xf32> to vector<16x128xf32>
    %139 = arith.addf %136, %138 : vector<16x128xf32>
    %c0_88 = arith.constant 0 : index
    %c0_89 = arith.constant 0 : index
    %140 = vector.load %arg15[%c0_88, %c0_89] : memref<16x128xf32, #tpu.memory_space<vmem>>, vector<16x128xf32>
    tpu.vector_store %arg15[%c0_88, %c0_89], %139 {strides = array<i32>} : memref<16x128xf32, #tpu.memory_space<vmem>>, vector<16x128xf32>,
    %c0_90 = arith.constant 0 : index
    %c0_91 = arith.constant 0 : index
    %141 = tpu.strided_load %arg15[%c0_90, %c0_91] {strides = array<i32: 2, 1>} : memref<16x128xf32, #tpu.memory_space<vmem>>, vector<8x128xf32>
    %c1_92 = arith.constant 1 : index
    %c0_93 = arith.constant 0 : index
    %142 = tpu.strided_load %arg15[%c1_92, %c0_93] {strides = array<i32: 2, 1>} : memref<16x128xf32, #tpu.memory_space<vmem>>, vector<8x128xf32>
    %c1_94 = arith.constant 1 : index
    %c0_95 = arith.constant 0 : index
    %c0_96 = arith.constant 0 : index
    %143 = vector.load %arg8[%c1_94, %c0_95, %c0_96] : memref<3x128x128xf32, #tpu.memory_space<vmem>>, vector<1x128x128xf32>
    %144 = vector.shape_cast %143 : vector<1x128x128xf32> to vector<128x128xf32>
    %cst_97 = arith.constant dense<0.000000e+00> : vector<8x128xf32>
    %145 = tpu.matmul %141, %144, %cst_97 {dimension_numbers = #tpu.dot_dimension_numbers<[1], [0], [0], [1], [0, 0, 1, 1], [], []>} : vector<8x128xf32>, vector<128x128xf32>, vector<8x128xf32> -> vector<8x128xf32>
    %c2_98 = arith.constant 2 : index
    %c0_99 = arith.constant 0 : index
    %c0_100 = arith.constant 0 : index
    %146 = vector.load %arg8[%c2_98, %c0_99, %c0_100] : memref<3x128x128xf32, #tpu.memory_space<vmem>>, vector<1x128x128xf32>
    %147 = vector.shape_cast %146 : vector<1x128x128xf32> to vector<128x128xf32>
    %cst_101 = arith.constant dense<0.000000e+00> : vector<8x128xf32>
    %148 = tpu.matmul %142, %147, %cst_101 {dimension_numbers = #tpu.dot_dimension_numbers<[1], [0], [0], [1], [0, 0, 1, 1], [], []>} : vector<8x128xf32>, vector<128x128xf32>, vector<8x128xf32> -> vector<8x128xf32>
    %149 = arith.addf %145, %148 : vector<8x128xf32>
    %c0_102 = arith.constant 0 : index
    %c0_103 = arith.constant 0 : index
    %150 = vector.load %arg9[%c0_102, %c0_103] : memref<2x128xf32, #tpu.memory_space<vmem>>, vector<1x128xf32>
    %151 = vector.broadcast %150 : vector<1x128xf32> to vector<8x128xf32>
    %152 = arith.addf %149, %151 : vector<8x128xf32>
    %cst_104 = arith.constant 0.000000e+00 : f32
    %153 = vector.broadcast %cst_104 : f32 to vector<8x128xf32>
    %154 = arith.cmpf ogt, %152, %153 : vector<8x128xf32>
    %cst_105 = arith.constant 2.000000e-01 : f32
    %155 = vector.broadcast %cst_105 : f32 to vector<8x128xf32>
    %156 = arith.mulf %155, %152 : vector<8x128xf32>
    %157 = arith.select %154, %152, %156 : vector<8x128xi1>, vector<8x128xf32>
    %c1_106 = arith.constant 1 : index
    %c0_107 = arith.constant 0 : index
    %158 = vector.load %arg9[%c1_106, %c0_107] : memref<2x128xf32, #tpu.memory_space<vmem>>, vector<1x128xf32>
    %159 = vector.broadcast %158 : vector<1x128xf32> to vector<8x128xf32>
    %160 = arith.addf %157, %159 : vector<8x128xf32>
    %c0_108 = arith.constant 0 : index
    %c0_109 = arith.constant 0 : index
    %161 = vector.load %arg10[%c0_108, %c0_109] : memref<128x1xf32, #tpu.memory_space<vmem>>, vector<128x1xf32>
    %cst_110 = arith.constant dense<0.000000e+00> : vector<8x1xf32>
    %162 = tpu.matmul %160, %161, %cst_110 {dimension_numbers = #tpu.dot_dimension_numbers<[1], [0], [0], [1], [0, 0, 1, 1], [], []>} : vector<8x128xf32>, vector<128x1xf32>, vector<8x1xf32> -> vector<8x1xf32>
    %c0_111 = arith.constant 0 : index
    %c0_112 = arith.constant 0 : index
    %163 = vector.load %arg11[%c0_111, %c0_112] : memref<1x1xf32, #tpu.memory_space<vmem>>, vector<1x1xf32>
    %164 = vector.broadcast %163 : vector<1x1xf32> to vector<8x1xf32>
    %165 = arith.addf %162, %164 : vector<8x1xf32>
    %cst_113 = arith.constant 0.000000e+00 : f32
    %166 = vector.broadcast %cst_113 : f32 to vector<8x1xf32>
    %167 = arith.subf %166, %165 : vector<8x1xf32>
    %168 = math.exp %167 : vector<8x1xf32>
    %cst_114 = arith.constant 1.000000e+00 : f32
    %169 = vector.broadcast %cst_114 : f32 to vector<8x1xf32>
    %170 = arith.addf %169, %168 : vector<8x1xf32>
    %cst_115 = arith.constant 1.000000e+00 : f32
    %171 = vector.broadcast %cst_115 : f32 to vector<8x1xf32>
    %172 = arith.divf %171, %170 : vector<8x1xf32>
    %c0_116 = arith.constant 0 : index
    %c0_117 = arith.constant 0 : index
    %173 = vector.load %arg12[%c0_116, %c0_117] : memref<8x1xf32, #tpu.memory_space<vmem>>, vector<8x1xf32>
    tpu.vector_store %arg12[%c0_116, %c0_117], %172 {strides = array<i32>} : memref<8x1xf32, #tpu.memory_space<vmem>>, vector<8x1xf32>,
    return
  }
  func.func @transform_0(%arg0: i32) -> (i32, i32) {
    %c0_i32 = arith.constant 0 : i32
    %c0_i32_0 = arith.constant 0 : i32
    return %arg0, %c0_i32 : i32, i32
  }
  func.func @transform_1(%arg0: i32) -> (i32, i32, i32) {
    %c0_i32 = arith.constant 0 : i32
    %c0_i32_0 = arith.constant 0 : i32
    %c0_i32_1 = arith.constant 0 : i32
    %c0_i32_2 = arith.constant 0 : i32
    return %c0_i32, %c0_i32_0, %c0_i32_1 : i32, i32, i32
  }
  func.func @transform_2(%arg0: i32) -> (i32, i32) {
    %c0_i32 = arith.constant 0 : i32
    %c0_i32_0 = arith.constant 0 : i32
    %c0_i32_1 = arith.constant 0 : i32
    return %c0_i32, %c0_i32_0 : i32, i32
  }
  func.func @transform_3(%arg0: i32) -> (i32, i32, i32) {
    %c0_i32 = arith.constant 0 : i32
    %c0_i32_0 = arith.constant 0 : i32
    %c0_i32_1 = arith.constant 0 : i32
    %c0_i32_2 = arith.constant 0 : i32
    return %c0_i32, %c0_i32_0, %c0_i32_1 : i32, i32, i32
  }
  func.func @transform_4(%arg0: i32) -> (i32, i32) {
    %c0_i32 = arith.constant 0 : i32
    %c0_i32_0 = arith.constant 0 : i32
    %c0_i32_1 = arith.constant 0 : i32
    return %c0_i32, %c0_i32_0 : i32, i32
  }
  func.func @transform_5(%arg0: i32) -> (i32, i32, i32) {
    %c0_i32 = arith.constant 0 : i32
    %c0_i32_0 = arith.constant 0 : i32
    %c0_i32_1 = arith.constant 0 : i32
    %c0_i32_2 = arith.constant 0 : i32
    return %c0_i32, %c0_i32_0, %c0_i32_1 : i32, i32, i32
  }
  func.func @transform_6(%arg0: i32) -> (i32, i32) {
    %c0_i32 = arith.constant 0 : i32
    %c0_i32_0 = arith.constant 0 : i32
    %c0_i32_1 = arith.constant 0 : i32
    return %c0_i32, %c0_i32_0 : i32, i32
  }
  func.func @transform_7(%arg0: i32) -> (i32, i32, i32) {
    %c0_i32 = arith.constant 0 : i32
    %c0_i32_0 = arith.constant 0 : i32
    %c0_i32_1 = arith.constant 0 : i32
    %c0_i32_2 = arith.constant 0 : i32
    return %c0_i32, %c0_i32_0, %c0_i32_1 : i32, i32, i32
  }
  func.func @transform_8(%arg0: i32) -> (i32, i32) {
    %c0_i32 = arith.constant 0 : i32
    %c0_i32_0 = arith.constant 0 : i32
    %c0_i32_1 = arith.constant 0 : i32
    return %c0_i32, %c0_i32_0 : i32, i32
  }
  func.func @transform_9(%arg0: i32) -> (i32, i32) {
    %c0_i32 = arith.constant 0 : i32
    %c0_i32_0 = arith.constant 0 : i32
    %c0_i32_1 = arith.constant 0 : i32
    return %c0_i32, %c0_i32_0 : i32, i32
  }
  func.func @transform_10(%arg0: i32) -> (i32, i32) {
    %c0_i32 = arith.constant 0 : i32
    %c0_i32_0 = arith.constant 0 : i32
    %c0_i32_1 = arith.constant 0 : i32
    return %c0_i32, %c0_i32_0 : i32, i32
  }
  func.func @transform_11(%arg0: i32) -> (i32, i32) {
    %c0_i32 = arith.constant 0 : i32
    %c0_i32_0 = arith.constant 0 : i32
    return %arg0, %c0_i32 : i32, i32
  }
}

</mosaic_0001>

<bundles_post_ra>
// kernel: tpu_custom_call.1
= control target key start
LH: loop header
LB: loop body
LE: loop exit
PB: predicated region body
PF: predicated region fallthrough
CT: control target
= control target key end

     0   :  { %s2444_s0 = inlined_call_operand.vmem [shape: f32[256,64], index: 0, kind: input, shape index: {}]   ;;  %s2445_s1 = inlined_call_operand.hbm [shape: f32[3,64,128], index: 1, kind: input, shape index: {}]   ;;  %s2446_s2 = inlined_call_operand.vmem [shape: f32[2,128], index: 2, kind: input, shape index: {}]   ;;  %s2447_s3 = inlined_call_operand.vmem [shape: f32[3,128,128], index: 3, kind: input, shape index: {}]   ;;  %s2448_s4 = inlined_call_operand.vmem [shape: f32[2,128], index: 4, kind: input, shape index: {}]   ;;  %s2449_s5 = inlined_call_operand.hbm [shape: f32[3,128,128], index: 5, kind: input, shape index: {}]   ;;  %s2450_s6 = inlined_call_operand.hbm [shape: f32[2,128], index: 6, kind: input, shape index: {}]   ;;  %s2451_s7 = inlined_call_operand.hbm [shape: f32[3,128,128], index: 7, kind: input, shape index: {}]   ;;  %s2452_s8 = inlined_call_operand.hbm [shape: f32[2,128], index: 8, kind: input, shape index: {}]   ;;  %s2453_s9 = inlined_call_operand.vmem [shape: f32[128,1], index: 9, kind: input, shape index: {}]   ;;  %s2454_s10 = inlined_call_operand.<no memory space> [shape: f32[1,1], index: 10, kind: input, shape index: {}]   ;;  %s2455_s11 = inlined_call_operand.vmem [shape: f32[16,1], index: 11, kind: output, shape index: {}]  }
   0x1   :  { %v16_v0 = vstv %s2454_s10 }
   0x2   :  { %17 = vst [vmem:[#allocation5] sm:$0x1] %v16_v0 }
   0x3   :  { %18 = vsyncpa [#allocation7], 0 }
   0x4   :  { %19 = vsyncpa [#allocation9], 0 }
   0x5   :  { %20 = vsyncpa [#allocation12], 0  ;;  %s2016_s19 = smov 0  }
   0x6 LB: > { %s2022_s20 = sadd.s32 4294967295, %s1944_s19   ;;  %p1595_p0 = scmp.ge.s32.totalorder %s1944_s19, 1  ;;  %s1944_s19 = sphi %s2016_s19, %s26_s19  }
   0x7   : > { %p293_p1 = scmp.lt.s32.totalorder %s1944_s19, 3  ;;  %p1738_p2 = scmp.eq.s32.totalorder %s2022_s20, 0 }
   0x8   : > { %s327_s22 = sshll.u32 %s2449_s5, 4  ;;  %s353_s26 = sshll.u32 %s2451_s7, 4  ;;  %s328_s22 = int_to_ptr.hbm [resolvable:$true] %s327_s22  ;;  %s354_s26 = int_to_ptr.hbm [resolvable:$true] %s353_s26 }
   0x9   : > { %p2030_p3 = pnand %p1595_p0, %p293_p1  ;;  %s1946_s27 = smov [#allocation8]  }
   0xa   : > { %s329_s28 = sshll.u32 %s1946_s27, 4  ;;  %s1947_s30 = smov [#allocation11]   ;;  %s330_s28 = int_to_ptr.vmem [resolvable:$true] %s329_s28 }
   0xb   : > { %p1722_p4 = pneg %p2030_p3  ;;  %s355_s12 = sshll.u32 %s1947_s30, 4  ;;  %s356_s12 = int_to_ptr.vmem [resolvable:$true] %s355_s12 }
   0xc   : > { %s304_s15 = sshll.u32 %s2445_s1, 4  ;;  %s1948_s16 = smov 128   ;;  %s305_s15 = int_to_ptr.hbm [resolvable:$true] %s304_s15 }
   0xd   : > { %p2041_p5 = pnand %p1738_p2, %p1722_p4  ;;  %s1949_s17 = smov 8  }
   0xe   : > { %s1950_s18 = smov [#allocation6]   ;;  %s342_s25 = sshll.u32 %s2450_s6, 4  ;;  %s343_s25 = int_to_ptr.hbm [resolvable:$true] %s342_s25 }
   0xf   : > { %1728 = dma.hbm_to_vmem [thread:$0]  (!%p2041_p5), %s328_s22, 6144, %s330_s28, [#allocation9], %s1948_s16, %s1948_s16, %s1949_s17  }
  0x10   : > { %1734 = dma.hbm_to_vmem [thread:$0]  (!%p2041_p5), %s354_s26, 6144, %s356_s12, [#allocation12], %s1948_s16, %s1948_s16, %s1949_s17  }
  0x11   : > { %s306_s10 = sshll.u32 %s1950_s18, 4  ;;  %s368_s13 = sshll.u32 %s2452_s8, 4  ;;  %s307_s10 = int_to_ptr.vmem [resolvable:$true] %s306_s10  ;;  %s369_s13 = int_to_ptr.hbm [resolvable:$true] %s368_s13 }
  0x12   : > { %1725 = dma.hbm_to_vmem [thread:$0]  (!%p2041_p5), %s305_s15, 3072, %s307_s10, [#allocation7], %s1948_s16, %s1948_s16, %s1949_s17  }
  0x13   : > { %s1951_s14 = smov [#allocation10]   ;;  %s1952_s26 = smov [#allocation13]  }
  0x14   : > { %s344_s22 = sshll.u32 %s1951_s14, 4  ;;  %s370_s28 = sshll.u32 %s1952_s26, 4  ;;  %s345_s22 = int_to_ptr.vmem [resolvable:$true] %s344_s22  ;;  %s371_s28 = int_to_ptr.vmem [resolvable:$true] %s370_s28 }
  0x15   : > { %1731 = dma.hbm_to_vmem [thread:$0]  (!%p2041_p5), %s343_s25, 32, %s345_s22, [#allocation9]  }
  0x16   : > { %1737 = dma.hbm_to_vmem [thread:$0]  (!%p2041_p5), %s369_s13, 32, %s371_s28, [#allocation12]  }
  0x17   : > { %398 = sbr.rel (%p2030_p3) target bundleno = 897 (0x381), region = 64 }
  0x1c   : > { %1931 = dma.done.wait (%p1738_p2), [#allocation7], 3072  }
  0x1d   : > { %1933 = vsyncadd (%p1738_p2), [#allocation7], 4294964224 }
  0x1e   : > { %1935 = dma.done.wait (%p1738_p2), [#allocation9], 6176  }
  0x1f   : > { %1937 = vsyncadd (%p1738_p2), [#allocation9], 4294961120 }
  0x20   : > { %1939 = dma.done.wait (%p1738_p2), [#allocation12], 6176  }
  0x21   : > { %1941 = vsyncadd (%p1738_p2), [#allocation12], 4294961120  ;;  %s1608_s23 = sshll.u32 %s2022_s20, 4  ;;  %v656_v1 = vlaneseq  ;;  %v793_v2 = vld [vmem:[#allocation6 + $0x38] sm:$0xff]  ;;  %v792_v3 = vld [vmem:[#allocation6 + $0x30] sm:$0xff]  ;;  %vm517_vm2 = vcmask 523264  }
  0x22   : > { %p459_p6 = scmp.lt.s32.totalorder %s1608_s23, 31  ;;  %v516_v4 = vld [vmem:[#allocation6 + $0xb8] sm:$0xff]  ;;  %826 = vmatpush.msra.mxu2 %v793_v2  ;;  %v515_v6 = vld [vmem:[#allocation6 + $0xb0] sm:$0xff]  ;;  %v791_v7 = vld [vmem:[#allocation6 + $0x28] sm:$0xff]  ;;  %p464_p7 = scmp.lt.s32.totalorder %s2022_s20, 1 }
  0x23   : > { %550 = vmatpush.msra.mxu0 %v516_v4  ;;  %v507_v5 = vld [vmem:[#allocation6 + $0x78] sm:$0xff]  ;;  %v506_v8 = vld [vmem:[#allocation6 + $0x70] sm:$0xff]  ;;  %v514_v9 = vld [vmem:[#allocation6 + $0xa8] sm:$0xff]  ;;  %v2079_v10 = vshrl.u32 %v656_v1, 7 }
  0x24   : > { %s2461_s23 = smov (!%p459_p6, %s1608_s23), 31  ;;  %615 = vmatpush.msra.mxu1 %v507_v5  ;;  %827 = vmatpush.msra.mxu2 %v792_v3  ;;  %v505_v11 = vld [vmem:[#allocation6 + $0x68] sm:$0xff]  ;;  %v790_v12 = vld [vmem:[#allocation6 + $0x20] sm:$0xff]  ;;  %v789_v15 = vld [vmem:[#allocation6 + $0x18] sm:$0xff]  ;;  %s2463_s20 = smov (!%p464_p7, %s2022_s20), 1 }
  0x25   : > { %s1609_s29 = sshll.u32 %s2461_s23, 3  ;;  %551 = vmatpush.msra.mxu0 %v515_v6  ;;  %v513_v13 = vld [vmem:[#allocation6 + $0xa0] sm:$0xff]  ;;  %v512_v16 = vld [vmem:[#allocation6 + $0x98] sm:$0xff]  ;;  %v678_v18 = vand.u32 7, %v2079_v10  ;;  %vm658_vm0 = vcmp.lt.s32.totalorder %v2079_v10, 1  ;;  %v788_v22 = vld [vmem:[#allocation6 + $0x10] sm:$0xff] }
  0x26   : > { %s2084_s16 = scalar_lea.vmem %s2444_s0, %s1609_s29  ;;  %616 = vmatpush.msra.mxu1 %v506_v8  ;;  %828 = vmatpush.msra.mxu2 %v791_v7  ;;  %v504_v14 = vld [vmem:[#allocation6 + $0x60] sm:$0xff]  ;;  %v503_v19 = vld [vmem:[#allocation6 + $0x58] sm:$0xff]  ;;  %v511_v23 = vld [vmem:[#allocation6 + $0x90] sm:$0xff]  ;;  %v2102_v31 = vadd.s32 8, %v2079_v10  ;;  %v2115_v41 = vadd.s32 16, %v2079_v10  ;;  %v2126_v48 = vadd.s32 24, %v2079_v10 }
  0x27   : > { %552 = vmatpush.msra.mxu0 %v514_v9  ;;  %v1618_v17 = vld [vmem:[%s2084_s16 + $0x1] ss:$2 sm:$0xff]  ;;  %v2089_v20 = vld [vmem:[%s2084_s16 + $0x71] ss:$2 sm:$0xff]  ;;  %vm2097_vm1 = vcmp.eq.s32.totalorder %v678_v18, 0  ;;  %v670_v55 = vadd.s32 32, %v2079_v10 }
  0x28   : > { %617 = vmatpush.msra.mxu1 %v505_v11  ;;  %829 = vmatpush.msra.mxu2 %v790_v12  ;;  %v648_v21 = vrot.slane %v1618_v17, 7  ;;  %v655_v24 = vrot.slane %v2089_v20, 7  ;;  %v502_v25 = vld [vmem:[#allocation6 + $0x50] sm:$0xff]  ;;  %v787_v26 = vld [vmem:[#allocation6 + $0x8] sm:$0xff]  ;;  %v786_v27 = vld [vmem:[#allocation6] sm:$0xff]  ;;  %v685_v39 = vand.u32 7, %v2102_v31 }
  0x29   : > { %553 = vmatpush.msra.mxu0 %v513_v13  ;;  %v510_v30 = vld [vmem:[#allocation6 + $0x88] sm:$0xff]  ;;  %v509_v33 = vld [vmem:[#allocation6 + $0x80] sm:$0xff]  ;;  %v1620_v42 = vld [vmem:[%s2084_s16 + $0x21] ss:$2 sm:$0xff]  ;;  %v692_v46 = vand.u32 7, %v2115_v41  ;;  %v699_v53 = vand.u32 7, %v2126_v48 }
  0x2a   : > { %618 = vmatpush.msra.mxu1 %v504_v14  ;;  %830 = vmatpush.msra.mxu2 %v789_v15  ;;  %v666_v28 = vsel %vm658_vm0, %v655_v24, %v648_v21  ;;  %v501_v32 = vld [vmem:[#allocation6 + $0x48] sm:$0xff]  ;;  %v500_v37 = vld [vmem:[#allocation6 + $0x40] sm:$0xff]  ;;  %vm771_vm3 = vcmp.eq.s32.totalorder %v685_v39, 0  ;;  %v650_v45 = vrot.slane %v1620_v42, 7  ;;  %v1622_v56 = vld [vmem:[%s2084_s16 + $0x41] ss:$2 sm:$0xff] }
  0x2b   : > { %554 = vmatpush.msra.mxu0 %v512_v16  ;;  %v1619_v34 = vld [vmem:[%s2084_s16 + $0x11] ss:$2 sm:$0xff]  ;;  %v468_v35 = vld [vmem:[%s2084_s16] ss:$2 sm:$0xff]  ;;  %v778_v36 = vsel %vm2097_vm1, 0.0, %v666_v28  ;;  %vm772_vm4 = vcmp.eq.s32.totalorder %v692_v46, 0 }
  0x2c   : > { %619 = vmatpush.msra.mxu1 %v503_v19  ;;  %831 = vmatpush.msra.mxu2 %v788_v22  ;;  %v649_v38 = vrot.slane %v1619_v34, 7  ;;  %v1611_v44 = vld [vmem:[%s2084_s16 + $0x10] ss:$2 sm:$0xff]  ;;  %v1621_v49 = vld [vmem:[%s2084_s16 + $0x31] ss:$2 sm:$0xff]  ;;  %vm773_vm5 = vcmp.eq.s32.totalorder %v699_v53, 0 }
  0x2d   : > { %555 = vmatpush.msra.mxu0 %v511_v23  ;;  %v1612_v51 = vld [vmem:[%s2084_s16 + $0x20] ss:$2 sm:$0xff]  ;;  %v651_v52 = vrot.slane %v1621_v49, 7  ;;  %v1613_v58 = vld [vmem:[%s2084_s16 + $0x30] ss:$2 sm:$0xff]  ;;  %v652_v59 = vrot.slane %v1622_v56, 7 }
  0x2e   : > { %620 = vmatpush.msra.mxu1 %v502_v25  ;;  %832 = vmatpush.msra.mxu2 %v787_v26  ;;  %v665_v40 = vsel %vm658_vm0, %v648_v21, %v649_v38  ;;  %v664_v47 = vsel %vm658_vm0, %v649_v38, %v650_v45  ;;  %v706_v60 = vand.u32 7, %v670_v55  ;;  %v1681_v61 = vld [vmem:[%s2447_s3 + $0x178] sm:$0xff]  ;;  %v1680_v62 = vld [vmem:[%s2447_s3 + $0x170] sm:$0xff]  ;;  %v671_v0 = vadd.s32 40, %v2079_v10  ;;  %v1614_v3 = vld [vmem:[%s2084_s16 + $0x40] ss:$2 sm:$0xff] }
  0x2f   : > { %556 = vmatpush.msra.mxu0 %v510_v30  ;;  %v779_v43 = vsel %vm771_vm3, 0.0, %v665_v40  ;;  %v780_v50 = vsel %vm772_vm4, 0.0, %v664_v47  ;;  %v663_v54 = vsel %vm658_vm0, %v650_v45, %v651_v52  ;;  %v662_v63 = vsel %vm658_vm0, %v651_v52, %v652_v59  ;;  %968 = vmatpush.msra.mxu3 %v1681_v61  ;;  %v1623_v1 = vld [vmem:[%s2084_s16 + $0x51] ss:$2 sm:$0xff]  ;;  %v1624_v8 = vld [vmem:[%s2084_s16 + $0x61] ss:$2 sm:$0xff] }
  0x30   : > { %621 = vmatpush.msra.mxu1 %v501_v32  ;;  %833 = vmatpush.msra.mxu2 %v786_v27  ;;  %v781_v57 = vsel %vm773_vm5, 0.0, %v663_v54  ;;  %vm774_vm6 = vcmp.eq.s32.totalorder %v706_v60, 0  ;;  %v653_v4 = vrot.slane %v1623_v1, 7  ;;  %v713_v5 = vand.u32 7, %v671_v0  ;;  %v1615_v11 = vld [vmem:[%s2084_s16 + $0x50] ss:$2 sm:$0xff] }
  0x31   : > { %557 = vmatpush.msra.mxu0 %v509_v33  ;;  %1642 = vmatmul.msk.f32.vlgmr.msra.gmra.mxu2 %vm517_vm2, %v778_v36  ;;  %v782_v2 = vsel %vm774_vm6, 0.0, %v662_v63  ;;  %v672_v7 = vadd.s32 48, %v2079_v10  ;;  %v654_v12 = vrot.slane %v1624_v8, 7  ;;  %v673_v15 = vadd.s32 56, %v2079_v10  ;;  %v1617_v22 = vld [vmem:[%s2084_s16 + $0x70] ss:$2 sm:$0xff] }
  0x32   : > { %622 = vmatpush.msra.mxu1 %v500_v37  ;;  %1626 = vmatmul.msk.f32.vlgmr.msra.gmra.mxu0 %vm517_vm2, %v1618_v17  ;;  %v661_v6 = vsel %vm658_vm0, %v652_v59, %v653_v4  ;;  %vm775_vm7 = vcmp.eq.s32.totalorder %v713_v5, 0  ;;  %v1616_v17 = vld [vmem:[%s2084_s16 + $0x60] ss:$2 sm:$0xff]  ;;  %v1673_v28 = vld [vmem:[%s2447_s3 + $0x138] sm:$0xff]  ;;  %v1672_v29 = vld [vmem:[%s2447_s3 + $0x130] sm:$0xff]  ;;  %s1610_s22 = sshll.u32 %s2463_s20, 3 }
  0x33   : > { %1634 = vmatmul.msk.f32.vlgmr.msra.gmra.mxu1 %vm517_vm2, %v468_v35  ;;  %969 = vmatpush.msra.mxu3 %v1680_v62  ;;  %v783_v9 = vsel %vm775_vm7, 0.0, %v661_v6  ;;  %v720_v13 = vand.u32 7, %v672_v7  ;;  %v660_v14 = vsel %vm658_vm0, %v653_v4, %v654_v12  ;;  %v727_v18 = vand.u32 7, %v673_v15  ;;  %v1679_v23 = vld [vmem:[%s2447_s3 + $0x168] sm:$0xff]  ;;  %v1678_v25 = vld [vmem:[%s2447_s3 + $0x160] sm:$0xff]  ;;  %v1669_v33 = vld [vmem:[%s2447_s3 + $0x118] sm:$0xff]  ;;  %s467_s23 = scalar_lea.vmem %s2455_s11, %s1610_s22 }
  0x34   : > { %v659_v19 = vsel %vm658_vm0, %v654_v12, %v655_v24  ;;  %v1677_v24 = vld [vmem:[%s2447_s3 + $0x158] sm:$0xff]  ;;  %v1675_v26 = vld [vmem:[%s2447_s3 + $0x148] sm:$0xff]  ;;  %v1674_v27 = vld [vmem:[%s2447_s3 + $0x140] sm:$0xff] }
  0x35   : > { %vm776_vm8 = vcmp.eq.s32.totalorder %v720_v13, 0  ;;  %vm777_vm9 = vcmp.eq.s32.totalorder %v727_v18, 0  ;;  %970 = vmatpush.msra.mxu3 %v1679_v23  ;;  %v1671_v30 = vld [vmem:[%s2447_s3 + $0x128] sm:$0xff]  ;;  %v1670_v32 = vld [vmem:[%s2447_s3 + $0x120] sm:$0xff]  ;;  %v1104_v45 = vld [vmem:[%s2447_s3 + $0x70] sm:$0xff] }
  0x36   : > { %v784_v16 = vsel %vm776_vm8, 0.0, %v660_v14  ;;  %v785_v21 = vsel %vm777_vm9, 0.0, %v659_v19  ;;  %v1667_v35 = vld [vmem:[%s2447_s3 + $0x108] sm:$0xff]  ;;  %v1666_v36 = vld [vmem:[%s2447_s3 + $0x100] sm:$0xff]  ;;  %v1101_v4 = vld [vmem:[%s2447_s3 + $0x58] sm:$0xff] }
  0x37   : > { %971 = vmatpush.msra.mxu3 %v1678_v25  ;;  %v2225_v40 = vld [vmem:[%s2446_s2] ss:$0 sm:$0xff]  ;;  %v1100_v5 = vld [vmem:[%s2447_s3 + $0x50] sm:$0xff]  ;;  %v1665_v6 = vld [vmem:[%s2447_s3 + $0xf8] sm:$0xff] }
  0x38   : > { %v1663_v14 = vld [vmem:[%s2447_s3 + $0xe8] sm:$0xff]  ;;  %v1662_v18 = vld [vmem:[%s2447_s3 + $0xe0] sm:$0xff]  ;;  %v1661_v25 = vld [vmem:[%s2447_s3 + $0xd8] sm:$0xff] }
  0x39   : > { %1643 = vmatmul.msk.f32.gmra.mxu2 %vm517_vm2, %v779_v43  ;;  %972 = vmatpush.msra.mxu3 %v1677_v24  ;;  %v1098_v23 = vld [vmem:[%s2447_s3 + $0x40] sm:$0xff] }
  0x3a   : > { %1627 = vmatmul.msk.f32.gmra.mxu0 %vm517_vm2, %v1619_v34  ;;  %v1668_v34 = vld [vmem:[%s2447_s3 + $0x110] sm:$0xff] }
  0x3b   : > { %1635 = vmatmul.msk.f32.gmra.mxu1 %vm517_vm2, %v1611_v44  ;;  %v1105_v44 = vld [vmem:[%s2447_s3 + $0x78] sm:$0xff] }
  0x3c   : > { %1106 = vmatpush.msrb.mxu0 %v1105_v44  ;;  %v1094_v44 = vld [vmem:[%s2447_s3 + $0x20] sm:$0xff] }
  0x3e   : > { %1107 = vmatpush.msrb.mxu0 %v1104_v45 }
  0x41   : > { %1644 = vmatmul.msk.f32.gmra.mxu2 %vm517_vm2, %v780_v50  ;;  %v2237_v50 = vld [vmem:[%s2446_s2 + $0x1] ss:$0 sm:$0xff] }
  0x42   : > { %1628 = vmatmul.msk.f32.gmra.mxu0 %vm517_vm2, %v1620_v42 }
  0x43   : > { %1636 = vmatmul.msk.f32.gmra.mxu1 %vm517_vm2, %v1612_v51 }
  0x49   : > { %1645 = vmatmul.msk.f32.gmra.mxu2 %vm517_vm2, %v781_v57  ;;  %v1103_v57 = vld [vmem:[%s2447_s3 + $0x68] sm:$0xff] }
  0x4a   : > { %1629 = vmatmul.msk.f32.gmra.mxu0 %vm517_vm2, %v1621_v49 }
  0x4b   : > { %1637 = vmatmul.msk.f32.gmra.mxu1 %vm517_vm2, %v1613_v58  ;;  %v1102_v58 = vld [vmem:[%s2447_s3 + $0x60] sm:$0xff]  ;;  %1108 = vmatpush.msrb.mxu0 %v1103_v57 }
  0x4d   : > { %1109 = vmatpush.msrb.mxu0 %v1102_v58 }
  0x4f   : > { %1110 = vmatpush.msrb.mxu0 %v1101_v4 }
  0x51   : > { %1646 = vmatmul.msk.f32.gmra.mxu2 %vm517_vm2, %v782_v2  ;;  %1111 = vmatpush.msrb.mxu0 %v1100_v5 }
  0x52   : > { %1630 = vmatmul.msk.f32.gmra.mxu0 %vm517_vm2, %v1622_v56 }
  0x53   : > { %1638 = vmatmul.msk.f32.gmra.mxu1 %vm517_vm2, %v1614_v3 }
  0x59   : > { %1647 = vmatmul.msk.f32.gmra.mxu2 %vm517_vm2, %v783_v9 }
  0x5a   : > { %1631 = vmatmul.msk.f32.gmra.mxu0 %vm517_vm2, %v1623_v1 }
  0x5b   : > { %1639 = vmatmul.msk.f32.gmra.mxu1 %vm517_vm2, %v1615_v11  ;;  %v1664_v11 = vld [vmem:[%s2447_s3 + $0xf0] sm:$0xff] }
  0x61   : > { %1648 = vmatmul.msk.f32.gmra.mxu2 %vm517_vm2, %v784_v16 }
  0x62   : > { %1632 = vmatmul.msk.f32.gmra.mxu0 %vm517_vm2, %v1624_v8 }
  0x63   : > { %1640 = vmatmul.msk.f32.gmra.mxu1 %vm517_vm2, %v1616_v17 }
  0x69   : > { %1649 = vmatmul.msk.f32.gmra.mxu2 %vm517_vm2, %v785_v21 }
  0x6a   : > { %1633 = vmatmul.msk.f32.gmra.mxu0 %vm517_vm2, %v2089_v20  ;;  %v1676_v20 = vld [vmem:[%s2447_s3 + $0x150] sm:$0xff] }
  0x6b   : > { %1641 = vmatmul.msk.f32.gmra.mxu1 %vm517_vm2, %v1617_v22  ;;  %973 = vmatpush.msra.mxu3 %v1676_v20  ;;  %v1099_v22 = vld [vmem:[%s2447_s3 + $0x48] sm:$0xff] }
  0x6c   : > { %1112 = vmatpush.msrb.mxu0 %v1099_v22 }
  0x6d   : > { %974 = vmatpush.msra.mxu3 %v1675_v26 }
  0x6e   : > { %1113 = vmatpush.msrb.mxu0 %v1098_v23 }
  0x6f   : > { %975 = vmatpush.msra.mxu3 %v1674_v27  ;;  %v1660_v27 = vld [vmem:[%s2447_s3 + $0xd0] sm:$0xff] }
  0x71   : > { %976 = vmatpush.msra.mxu3 %v1673_v28 }
  0x73   : > { %977 = vmatpush.msra.mxu3 %v1672_v29 }
  0x75   : > { %978 = vmatpush.msra.mxu3 %v1671_v30  ;;  %v1097_v30 = vld [vmem:[%s2447_s3 + $0x38] sm:$0xff] }
  0x76   : > { %1114 = vmatpush.msrb.mxu0 %v1097_v30 }
  0x77   : > { %979 = vmatpush.msra.mxu3 %v1670_v32  ;;  %v1659_v32 = vld [vmem:[%s2447_s3 + $0xc8] sm:$0xff] }
  0x79   : > { %980 = vmatpush.msra.mxu3 %v1669_v33 }
  0x7b   : > { %981 = vmatpush.msra.mxu3 %v1668_v34  ;;  %v1096_v34 = vld [vmem:[%s2447_s3 + $0x30] sm:$0xff] }
  0x7c   : > { %1115 = vmatpush.msrb.mxu0 %v1096_v34 }
  0x7d   : > { %982 = vmatpush.msra.mxu3 %v1667_v35 }
  0x7f   : > { %983 = vmatpush.msra.mxu3 %v1666_v36 }
  0x81   : > { %997 = vmatpush.msrb.mxu3 %v1665_v6  ;;  %v1651_v6 = vld [vmem:[%s2447_s3 + $0x88] sm:$0xff] }
  0x83   : > { %998 = vmatpush.msrb.mxu3 %v1664_v11 }
  0x85   : > { %999 = vmatpush.msrb.mxu3 %v1663_v14 }
  0x87   : > { %1000 = vmatpush.msrb.mxu3 %v1662_v18 }
  0x89   : > { %1001 = vmatpush.msrb.mxu3 %v1661_v25 }
  0x8b   : > { %1002 = vmatpush.msrb.mxu3 %v1660_v27 }
  0x8d   : > { %1003 = vmatpush.msrb.mxu3 %v1659_v32 }
  0xaf   : > { %v559_v37 = vpop.f32.mrf.mxu0 }
  0xb0   : > { %v624_v38 = vpop.f32.mrf.mxu1 }
  0xb1   : > { %v625_v39 = vadd.f32 %v624_v38, %v559_v37  ;;  %v1658_v37 = vld [vmem:[%s2447_s3 + $0xc0] sm:$0xff] }
  0xb2   : > { %1004 = vmatpush.msrb.mxu3 %v1658_v37 }
  0xb4   : > { %v835_v42 = vpop.f32.mrf.mxu2 }
  0xb5   : > { %v859_v43 = vadd.f32 %v835_v42, %v625_v39  ;;  %v1095_v39 = vld [vmem:[%s2447_s3 + $0x28] sm:$0xff]  ;;  %v1657_v42 = vld [vmem:[%s2447_s3 + $0xb8] sm:$0xff] }
  0xb6   : > { %1116 = vmatpush.msrb.mxu0 %v1095_v39  ;;  %1005 = vmatpush.msrb.mxu3 %v1657_v42  ;;  %v1059_v39 = vand.u32 3, %v2126_v48  ;;  %v1187_v48 = vld [vmem:[#allocation8 + $0xe0] sm:$0xff] }
  0xb7   : > { %v869_v46 = vadd.f32 %v2225_v40, %v859_v43  ;;  %v562_v47 = vpop.f32.mrf.mxu0  ;;  %v1656_v43 = vld [vmem:[%s2447_s3 + $0xb0] sm:$0xff] }
  0xb8   : > { %v627_v49 = vpop.f32.mrf.mxu1  ;;  %1117 = vmatpush.msrb.mxu0 %v1094_v44  ;;  %1006 = vmatpush.msrb.mxu3 %v1656_v43  ;;  %vm1699_vm6 = vcmp.ne.s32.totalorder %v1059_v39, 0  ;;  %v1288_v39 = vld [vmem:[#allocation8 + $0x10] sm:$0xff] }
  0xb9   : > { %vm877_vm10 = vcmp.gt.f32.partialorder %v869_v46, 0.0  ;;  %v885_v51 = vmul.f32 0.2, %v869_v46  ;;  %v628_v52 = vadd.f32 %v627_v49, %v562_v47  ;;  %v1093_v49 = vld [vmem:[%s2447_s3 + $0x18] sm:$0xff] }
  0xba   : > { %1118 = vmatpush.msrb.mxu0 %v1093_v49  ;;  %v1206_v49 = vld [vmem:[#allocation8 + $0x170] sm:$0xff] }
  0xbb   : > { %v893_v53 = vsel %vm877_vm10, %v869_v46, %v885_v51  ;;  %v1655_v51 = vld [vmem:[%s2447_s3 + $0xa8] sm:$0xff] }
  0xbc   : > { %v903_v54 = vadd.f32 %v2237_v50, %v893_v53  ;;  %v838_v55 = vpop.f32.mrf.mxu2  ;;  %1007 = vmatpush.msrb.mxu3 %v1655_v51  ;;  %v1205_v51 = vld [vmem:[#allocation8 + $0x168] sm:$0xff] }
  0xbd   : > { %v860_v56 = vadd.f32 %v838_v55, %v628_v52  ;;  %v1654_v55 = vld [vmem:[%s2447_s3 + $0xa0] sm:$0xff] }
  0xbe   : > { %911 = vst [vmem:[#allocation2] sm:$0xff] %v903_v54  ;;  %v1092_v54 = vld [vmem:[%s2447_s3 + $0x10] sm:$0xff]  ;;  %1008 = vmatpush.msrb.mxu3 %v1654_v55 }
  0xbf   : > { %v870_v59 = vadd.f32 %v2225_v40, %v860_v56  ;;  %v565_v60 = vpop.f32.mrf.mxu0  ;;  %1119 = vmatpush.msrb.mxu0 %v1092_v54  ;;  %v1203_v55 = vld [vmem:[#allocation8 + $0x158] sm:$0xff] }
  0xc0   : > { %v630_v61 = vpop.f32.mrf.mxu1 }
  0xc1   : > { %vm878_vm11 = vcmp.gt.f32.partialorder %v870_v59, 0.0  ;;  %v886_v62 = vmul.f32 0.2, %v870_v59  ;;  %v631_v63 = vadd.f32 %v630_v61, %v565_v60  ;;  %v1091_v61 = vld [vmem:[%s2447_s3 + $0x8] sm:$0xff] }
  0xc2   : > { %1120 = vmatpush.msrb.mxu0 %v1091_v61  ;;  %v1183_v61 = vld [vmem:[#allocation8 + $0xc0] sm:$0xff] }
  0xc3   : > { %v894_v0 = vsel %vm878_vm11, %v870_v59, %v886_v62  ;;  %v1653_v62 = vld [vmem:[%s2447_s3 + $0x98] sm:$0xff] }
  0xc4   : > { %v904_v1 = vadd.f32 %v2237_v50, %v894_v0  ;;  %v841_v2 = vpop.f32.mrf.mxu2  ;;  %v1090_v0 = vld [vmem:[%s2447_s3] sm:$0xff]  ;;  %1009 = vmatpush.msrb.mxu3 %v1653_v62  ;;  %v1200_v62 = vld [vmem:[#allocation8 + $0x140] sm:$0xff] }
  0xc5   : > { %v861_v3 = vadd.f32 %v841_v2, %v631_v63  ;;  %v1652_v63 = vld [vmem:[%s2447_s3 + $0x90] sm:$0xff]  ;;  %1121 = vmatpush.msrb.mxu0 %v1090_v0 }
  0xc6   : > { %912 = vst [vmem:[#allocation2 + $0x8] sm:$0xff] %v904_v1  ;;  %1010 = vmatpush.msrb.mxu3 %v1652_v63  ;;  %v1199_v63 = vld [vmem:[#allocation8 + $0x138] sm:$0xff] }
  0xc7   : > { %v871_v7 = vadd.f32 %v2225_v40, %v861_v3  ;;  %v568_v8 = vpop.f32.mrf.mxu0  ;;  %v1182_v0 = vld [vmem:[#allocation8 + $0xb8] sm:$0xff] }
  0xc8   : > { %v633_v9 = vpop.f32.mrf.mxu1  ;;  %1011 = vmatpush.msrb.mxu3 %v1651_v6  ;;  %v1180_v6 = vld [vmem:[#allocation8 + $0xa8] sm:$0xff] }
  0xc9   : > { %vm879_vm12 = vcmp.gt.f32.partialorder %v871_v7, 0.0  ;;  %v887_v12 = vmul.f32 0.2, %v871_v7  ;;  %v634_v13 = vadd.f32 %v633_v9, %v568_v8 }
  0xcb   : > { %v895_v15 = vsel %vm879_vm12, %v871_v7, %v887_v12  ;;  %v1650_v7 = vld [vmem:[%s2447_s3 + $0x80] sm:$0xff] }
  0xcc   : > { %v905_v16 = vadd.f32 %v2237_v50, %v895_v15  ;;  %v844_v17 = vpop.f32.mrf.mxu2  ;;  %1012 = vmatpush.msrb.mxu3 %v1650_v7  ;;  %v1300_v7 = vld [vmem:[#allocation8 + $0x70] sm:$0xff] }
  0xcd   : > { %v862_v19 = vadd.f32 %v844_v17, %v634_v13  ;;  %v2268_v21 = vld [vmem:[#allocation2 + $0x1] ss:$2 sm:$0xff] }
  0xce   : > { %913 = vst [vmem:[#allocation2 + $0x10] sm:$0xff] %v905_v16  ;;  %984 = vmatmul.f32.vlgmr.msra.gmra.mxu3 %v2268_v21  ;;  %v1026_v30 = vrot.slane %v2268_v21, 7  ;;  %v1052_v21 = vand.u32 3, %v2115_v41  ;;  %v1190_v41 = vld [vmem:[#allocation8 + $0xf8] sm:$0xff] }
  0xcf   : > { %v872_v24 = vadd.f32 %v2225_v40, %v862_v19  ;;  %v571_v20 = vpop.f32.mrf.mxu0  ;;  %1231 = vmatpush.msrb.mxu2 %v1190_v41  ;;  %v1287_v41 = vld [vmem:[#allocation8 + $0x8] sm:$0xff] }
  0xd0   : > { %v636_v26 = vpop.f32.mrf.mxu1  ;;  %vm1698_vm5 = vcmp.ne.s32.totalorder %v1052_v21, 0  ;;  %v1289_v21 = vld [vmem:[#allocation8 + $0x18] sm:$0xff] }
  0xd1   : > { %vm880_vm13 = vcmp.gt.f32.partialorder %v872_v24, 0.0  ;;  %v888_v28 = vmul.f32 0.2, %v872_v24  ;;  %v637_v29 = vadd.f32 %v636_v26, %v571_v20 }
  0xd3   : > { %v896_v33 = vsel %vm880_vm13, %v872_v24, %v888_v28  ;;  %v1038_v28 = vand.u32 3, %v2079_v10 }
  0xd4   : > { %v906_v35 = vadd.f32 %v2237_v50, %v896_v33  ;;  %v847_v36 = vpop.f32.mrf.mxu2 }
  0xd5   : > { %v863_v38 = vadd.f32 %v847_v36, %v637_v29  ;;  %vm1696_vm3 = vcmp.ne.s32.totalorder %v1038_v28, 0  ;;  %v1293_v28 = vld [vmem:[#allocation8 + $0x38] sm:$0xff] }
  0xd6   : > { %914 = vst [vmem:[#allocation2 + $0x18] sm:$0xff] %v906_v35  ;;  %v919_v35 = vld [vmem:[#allocation2] ss:$2 sm:$0xff] }
  0xd7   : > { %v873_v45 = vadd.f32 %v2225_v40, %v863_v38  ;;  %v574_v46 = vpop.f32.mrf.mxu0 }
  0xd8   : > { %v639_v47 = vpop.f32.mrf.mxu1 }
  0xd9   : > { %vm881_vm14 = vcmp.gt.f32.partialorder %v873_v45, 0.0  ;;  %v889_v52 = vmul.f32 0.2, %v873_v45  ;;  %v640_v53 = vadd.f32 %v639_v47, %v574_v46  ;;  %v1207_v46 = vld [vmem:[#allocation8 + $0x178] sm:$0xff]  ;;  %v1188_v47 = vld [vmem:[#allocation8 + $0xe8] sm:$0xff] }
  0xda   : > { %1208 = vmatpush.msrb.mxu1 %v1207_v46 }
  0xdb   : > { %v897_v56 = vsel %vm881_vm14, %v873_v45, %v889_v52  ;;  %v1189_v45 = vld [vmem:[#allocation8 + $0xf0] sm:$0xff]  ;;  %v1186_v52 = vld [vmem:[#allocation8 + $0xd8] sm:$0xff] }
  0xdc   : > { %v907_v57 = vadd.f32 %v2237_v50, %v897_v56  ;;  %v850_v58 = vpop.f32.mrf.mxu2  ;;  %1232 = vmatpush.msrb.mxu2 %v1189_v45  ;;  %1209 = vmatpush.msrb.mxu1 %v1206_v49  ;;  %v1185_v56 = vld [vmem:[#allocation8 + $0xd0] sm:$0xff] }
  0xdd   : > { %v864_v59 = vadd.f32 %v850_v58, %v640_v53  ;;  %v2323_v60 = vld [vmem:[#allocation2 + $0x11] ss:$2 sm:$0xff]  ;;  %v921_v37 = vld [vmem:[#allocation2 + $0x10] ss:$2 sm:$0xff] }
  0xde   : > { %915 = vst [vmem:[#allocation2 + $0x20] sm:$0xff] %v907_v57  ;;  %987 = vmatmul.f32.gmra.mxu3 %v2323_v60  ;;  %v1027_v34 = vrot.slane %v2323_v60, 7  ;;  %1233 = vmatpush.msrb.mxu2 %v1188_v47  ;;  %v1204_v53 = vld [vmem:[#allocation8 + $0x160] sm:$0xff]  ;;  %v1202_v57 = vld [vmem:[#allocation8 + $0x150] sm:$0xff]  ;;  %v1201_v60 = vld [vmem:[#allocation8 + $0x148] sm:$0xff] }
  0xdf   : > { %v874_v1 = vadd.f32 %v2225_v40, %v864_v59  ;;  %v577_v2 = vpop.f32.mrf.mxu0  ;;  %1210 = vmatpush.msrb.mxu1 %v1205_v51  ;;  %v1184_v59 = vld [vmem:[#allocation8 + $0xc8] sm:$0xff]  ;;  %v1286_v47 = vld [vmem:[#allocation8] sm:$0xff] }
  0xe0   : > { %v642_v3 = vpop.f32.mrf.mxu1  ;;  %1234 = vmatpush.msrb.mxu2 %v1187_v48 }
  0xe1   : > { %vm882_vm15 = vcmp.gt.f32.partialorder %v874_v1, 0.0  ;;  %v890_v4 = vmul.f32 0.2, %v874_v1  ;;  %v643_v5 = vadd.f32 %v642_v3, %v577_v2  ;;  %1211 = vmatpush.msrb.mxu1 %v1204_v53  ;;  %v1181_v2 = vld [vmem:[#allocation8 + $0xb0] sm:$0xff]  ;;  %v1301_v3 = vld [vmem:[#allocation8 + $0x78] sm:$0xff] }
  0xe2   : > { %1235 = vmatpush.msrb.mxu2 %v1186_v52  ;;  %1302 = vmatpush.msra.mxu3 %v1301_v3 }
  0xe3   : > { %v898_v8 = vsel %vm882_vm15, %v874_v1, %v890_v4  ;;  %1212 = vmatpush.msrb.mxu1 %v1203_v55  ;;  %v1198_v1 = vld [vmem:[#allocation8 + $0x130] sm:$0xff] }
  0xe4   : > { %v908_v9 = vadd.f32 %v2237_v50, %v898_v8  ;;  %v853_v11 = vpop.f32.mrf.mxu2  ;;  %1236 = vmatpush.msrb.mxu2 %v1185_v56  ;;  %1303 = vmatpush.msra.mxu3 %v1300_v7  ;;  %v1196_v8 = vld [vmem:[#allocation8 + $0x120] sm:$0xff]  ;;  %v1262_v7 = vand.u32 1, %v2079_v10 }
  0xe5   : > { %v865_v12 = vadd.f32 %v853_v11, %v643_v5  ;;  %1213 = vmatpush.msrb.mxu1 %v1202_v57  ;;  %v1197_v5 = vld [vmem:[#allocation8 + $0x128] sm:$0xff]  ;;  %v1358_v10 = vld [vmem:[#allocation11 + $0xd8] sm:$0xff] }
  0xe6   : > { %916 = vst [vmem:[#allocation2 + $0x28] sm:$0xff] %v908_v9  ;;  %1237 = vmatpush.msrb.mxu2 %v1184_v59  ;;  %v1179_v9 = vld [vmem:[#allocation8 + $0xa0] sm:$0xff]  ;;  %v1299_v11 = vld [vmem:[#allocation8 + $0x68] sm:$0xff]  ;;  %vm1700_vm11 = vcmp.ne.s32.totalorder %v1262_v7, 0 }
  0xe7   : > { %v875_v13 = vadd.f32 %v2225_v40, %v865_v12  ;;  %v580_v14 = vpop.f32.mrf.mxu0  ;;  %1214 = vmatpush.msrb.mxu1 %v1201_v60  ;;  %1304 = vmatpush.msra.mxu3 %v1299_v11  ;;  %v1195_v12 = vld [vmem:[#allocation8 + $0x118] sm:$0xff] }
  0xe8   : > { %v645_v15 = vpop.f32.mrf.mxu1  ;;  %1238 = vmatpush.msrb.mxu2 %v1183_v61 }
  0xe9   : > { %vm883_vm1 = vcmp.gt.f32.partialorder %v875_v13, 0.0  ;;  %v891_v16 = vmul.f32 0.2, %v875_v13  ;;  %v646_v17 = vadd.f32 %v645_v15, %v580_v14  ;;  %1215 = vmatpush.msrb.mxu1 %v1200_v62  ;;  %v1298_v14 = vld [vmem:[#allocation8 + $0x60] sm:$0xff]  ;;  %v1194_v15 = vld [vmem:[#allocation8 + $0x110] sm:$0xff] }
  0xea   : > { %1239 = vmatpush.msrb.mxu2 %v1182_v0  ;;  %1305 = vmatpush.msra.mxu3 %v1298_v14  ;;  %v1269_v14 = vand.u32 1, %v2102_v31 }
  0xeb   : > { %v899_v18 = vsel %vm883_vm1, %v875_v13, %v891_v16  ;;  %1216 = vmatpush.msrb.mxu1 %v1199_v63  ;;  %v1178_v13 = vld [vmem:[#allocation8 + $0x98] sm:$0xff]  ;;  %v1177_v16 = vld [vmem:[#allocation8 + $0x90] sm:$0xff] }
  0xec   : > { %v909_v19 = vadd.f32 %v2237_v50, %v899_v18  ;;  %v856_v22 = vpop.f32.mrf.mxu2  ;;  %1240 = vmatpush.msrb.mxu2 %v1181_v2  ;;  %vm1701_vm12 = vcmp.ne.s32.totalorder %v1269_v14, 0 }
  0xed   : > { %v866_v23 = vadd.f32 %v856_v22, %v646_v17  ;;  %v931_v25 = vld [vmem:[#allocation2 + $0x21] ss:$2 sm:$0xff]  ;;  %v923_v42 = vld [vmem:[#allocation2 + $0x20] ss:$2 sm:$0xff]  ;;  %1217 = vmatpush.msrb.mxu1 %v1198_v1 }
  0xee   : > { %917 = vst [vmem:[#allocation2 + $0x30] sm:$0xff] %v909_v19  ;;  %990 = vmatmul.f32.gmra.mxu3 %v931_v25  ;;  %v1028_v36 = vrot.slane %v931_v25, 7  ;;  %1241 = vmatpush.msrb.mxu2 %v1180_v6  ;;  %v1297_v17 = vld [vmem:[#allocation8 + $0x58] sm:$0xff]  ;;  %v1193_v19 = vld [vmem:[#allocation8 + $0x108] sm:$0xff]  ;;  %v1192_v25 = vld [vmem:[#allocation8 + $0x100] sm:$0xff] }
  0xef   : > { %v876_v24 = vadd.f32 %v2225_v40, %v866_v23  ;;  %v1045_v40 = vand.u32 3, %v2102_v31  ;;  %1218 = vmatpush.msrb.mxu1 %v1197_v5  ;;  %1306 = vmatpush.msra.mxu3 %v1297_v17  ;;  %v1176_v22 = vld [vmem:[#allocation8 + $0x88] sm:$0xff]  ;;  %v1296_v23 = vld [vmem:[#allocation8 + $0x50] sm:$0xff]  ;;  %v1362_v17 = vld [vmem:[#allocation11 + $0xf8] sm:$0xff] }
  0xf0   : > { %v1031_v38 = vsel %vm658_vm0, %v1027_v34, %v1028_v36  ;;  %1242 = vmatpush.msrb.mxu2 %v1179_v9  ;;  %v1375_v31 = vld [vmem:[#allocation11 + $0x158] sm:$0xff] }
  0xf1   : > { %vm884_vm2 = vcmp.gt.f32.partialorder %v876_v24, 0.0  ;;  %v892_v20 = vmul.f32 0.2, %v876_v24  ;;  %vm1697_vm4 = vcmp.ne.s32.totalorder %v1045_v40, 0  ;;  %1219 = vmatpush.msrb.mxu1 %v1196_v8  ;;  %1307 = vmatpush.msra.mxu3 %v1296_v23  ;;  %v1360_v23 = vld [vmem:[#allocation11 + $0xe8] sm:$0xff] }
  0xf2   : > { %1243 = vmatpush.msrb.mxu2 %v1178_v13 }
  0xf3   : > { %v900_v26 = vsel %vm884_vm2, %v876_v24, %v892_v20  ;;  %1220 = vmatpush.msrb.mxu1 %v1195_v12  ;;  %v1175_v24 = vld [vmem:[#allocation8 + $0x80] sm:$0xff]  ;;  %v1295_v20 = vld [vmem:[#allocation8 + $0x48] sm:$0xff] }
  0xf4   : > { %v910_v27 = vadd.f32 %v2237_v50, %v900_v26  ;;  %v1032_v50 = vsel %vm658_vm0, %v1026_v30, %v1027_v34  ;;  %1244 = vmatpush.msrb.mxu2 %v1177_v16  ;;  %1308 = vmatpush.msra.mxu3 %v1295_v20  ;;  %v1291_v34 = vld [vmem:[#allocation8 + $0x28] sm:$0xff]  ;;  %v1379_v16 = vld [vmem:[#allocation11 + $0x178] sm:$0xff]  ;;  %v1374_v20 = vld [vmem:[#allocation11 + $0x150] sm:$0xff] }
  0xf5   : > { %1221 = vmatpush.msrb.mxu1 %v1194_v15  ;;  %1380 = vmatpush.msra.mxu0 %v1379_v16 }
  0xf6   : > { %918 = vst [vmem:[#allocation2 + $0x38] sm:$0xff] %v910_v27  ;;  %1245 = vmatpush.msrb.mxu2 %v1176_v22  ;;  %v1294_v27 = vld [vmem:[#allocation8 + $0x40] sm:$0xff]  ;;  %v1377_v22 = vld [vmem:[#allocation11 + $0x168] sm:$0xff] }
  0xf7   : > { %1222 = vmatpush.msrb.mxu1 %v1193_v19  ;;  %1309 = vmatpush.msra.mxu3 %v1294_v27  ;;  %v1361_v19 = vld [vmem:[#allocation11 + $0xf0] sm:$0xff]  ;;  %v1373_v27 = vld [vmem:[#allocation11 + $0x148] sm:$0xff] }
  0xf8   : > { %1246 = vmatpush.msrb.mxu2 %v1175_v24  ;;  %v1359_v24 = vld [vmem:[#allocation11 + $0xe0] sm:$0xff] }
  0xf9   : > { %1223 = vmatpush.msrb.mxu1 %v1192_v25  ;;  %1310 = vmatpush.msra.mxu3 %v1293_v28  ;;  %v1376_v25 = vld [vmem:[#allocation11 + $0x160] sm:$0xff]  ;;  %v1356_v28 = vld [vmem:[#allocation11 + $0xc8] sm:$0xff] }
  0xfb   : > { %1400 = vmatpush.msra.mxu1 %v1362_v17  ;;  %v1433_v17 = vld [vmem:[%s2453_s9 + $0x20] sm:$0xff] }
  0xfd   : > { %v933_v29 = vld [vmem:[#allocation2 + $0x31] ss:$2 sm:$0xff]  ;;  %v925_v44 = vld [vmem:[#allocation2 + $0x30] ss:$2 sm:$0xff]  ;;  %1401 = vmatpush.msra.mxu1 %v1361_v19 }
  0xfe   : > { %993 = vmatmul.f32.gmra.mxu3 %v933_v29  ;;  %v1029_v32 = vrot.slane %v933_v29, 7  ;;  %v1431_v19 = vld [vmem:[%s2453_s9 + $0x10] sm:$0xff] }
  0xff   : > { %1402 = vmatpush.msra.mxu1 %v1360_v23  ;;  %v1429_v23 = vld [vmem:[%s2453_s9] sm:$0xff] }
 0x100   : > { %v1033_v33 = vsel %vm658_vm0, %v1029_v32, %v1026_v30  ;;  %v1030_v43 = vsel %vm658_vm0, %v1028_v36, %v1029_v32  ;;  %v1765_v32 = vld [vmem:[%s2448_s4] ss:$0 sm:$0xff] }
 0x101   : > { %1683 = vmatmul.msk.f32.vlgmr.msrb.gmra.mxu0 %vm1696_vm3, %v1033_v33  ;;  %v1292_v33 = vld [vmem:[#allocation8 + $0x30] sm:$0xff]  ;;  %1403 = vmatpush.msra.mxu1 %v1359_v24  ;;  %vm1488_vm3 = vcmask 7168  }
 0x102   : > { %1311 = vmatpush.msra.mxu3 %v1292_v33  ;;  %v1354_v33 = vld [vmem:[#allocation11 + $0xb8] sm:$0xff] }
 0x103   : > { %1404 = vmatpush.msra.mxu1 %v1358_v10 }
 0x104   : > { %1312 = vmatpush.msra.mxu3 %v1291_v34  ;;  %v1353_v34 = vld [vmem:[#allocation11 + $0xb0] sm:$0xff] }
 0x106   : > { %1013 = vmatmul.f32.vlgmr.msrb.gmra.mxu3 %v919_v35  ;;  %v1290_v35 = vld [vmem:[#allocation8 + $0x20] sm:$0xff] }
 0x107   : > { %1313 = vmatpush.msra.mxu3 %v1290_v35  ;;  %v1369_v35 = vld [vmem:[#allocation11 + $0x128] sm:$0xff] }
 0x109   : > { %1685 = vmatmul.msk.f32.gmra.mxu0 %vm1697_vm4, %v1032_v50  ;;  %1314 = vmatpush.msra.mxu3 %v1289_v21  ;;  %v1368_v21 = vld [vmem:[#allocation11 + $0x120] sm:$0xff] }
 0x10b   : > { %1315 = vmatpush.msra.mxu3 %v1288_v39  ;;  %v1366_v39 = vld [vmem:[#allocation11 + $0x110] sm:$0xff] }
 0x10d   : > { %1316 = vmatpush.msra.mxu3 %v1287_v41  ;;  %v1364_v41 = vld [vmem:[#allocation11 + $0x100] sm:$0xff] }
 0x10e   : > { %1016 = vmatmul.f32.gmra.mxu3 %v921_v37  ;;  %v1766_v37 = vld [vmem:[%s2448_s4 + $0x1] ss:$0 sm:$0xff] }
 0x10f   : > { %1317 = vmatpush.msra.mxu3 %v1286_v47  ;;  %v1443_v47 = vld [vmem:[%s2453_s9 + $0x70] sm:$0xff] }
 0x111   : > { %1687 = vmatmul.msk.f32.gmra.mxu0 %vm1698_vm5, %v1031_v38 }
 0x116   : > { %1019 = vmatmul.f32.gmra.mxu3 %v923_v42 }
 0x119   : > { %1689 = vmatmul.msk.f32.gmra.mxu0 %vm1699_vm6, %v1030_v43 }
 0x11e   : > { %1022 = vmatmul.f32.gmra.mxu3 %v925_v44 }
 0x151   : > { %v2364_v54 = vpop.f32.mrf.mxu3 }
 0x161   : > { %v2366_v58 = vpop.f32.mrf.mxu3 }
 0x171   : > { %v2368_v4 = vpop.f32.mrf.mxu3 }
 0x17e   : > { %v1123_v26 = vpop.f32.mrf.mxu0 }
 0x181   : > { %v2370_v18 = vpop.f32.mrf.mxu3 }
 0x186   : > { %v1126_v36 = vpop.f32.mrf.mxu0 }
 0x189   : > { %v1014_v29 = vpop.f32.mrf.mxu3 }
 0x18a   : > { %v1015_v30 = vadd.f32 %v1014_v29, %v2364_v54  ;;  %v1372_v29 = vld [vmem:[#allocation11 + $0x140] sm:$0xff] }
 0x18c   : > { %v1135_v40 = vadd.f32 %v1123_v26, %v1015_v30  ;;  %v1357_v26 = vld [vmem:[#allocation11 + $0xd0] sm:$0xff]  ;;  %v1355_v30 = vld [vmem:[#allocation11 + $0xc0] sm:$0xff] }
 0x18d   : > { %1405 = vmatpush.msra.mxu1 %v1357_v26  ;;  %v1770_v26 = vld [vmem:[#allocation13 + $0x1] ss:$0 sm:$0xff] }
 0x18e   : > { %v1141_v50 = vadd.f32 %v1765_v32, %v1135_v40  ;;  %v1129_v51 = vpop.f32.mrf.mxu0  ;;  %v1370_v40 = vld [vmem:[#allocation11 + $0x130] sm:$0xff] }
 0x18f   : > { %1406 = vmatpush.msra.mxu1 %v1356_v28 }
 0x190   : > { %vm1145_vm7 = vcmp.gt.f32.partialorder %v1141_v50, 0.0  ;;  %v1149_v38 = vmul.f32 0.2, %v1141_v50 }
 0x191   : > { %v1017_v42 = vpop.f32.mrf.mxu3  ;;  %1407 = vmatpush.msra.mxu1 %v1355_v30  ;;  %v1771_v30 = vld [vmem:[#allocation5] ss:$0 sm:$0xff] }
 0x192   : > { %v1153_v43 = vsel %vm1145_vm7, %v1141_v50, %v1149_v38  ;;  %v1018_v44 = vadd.f32 %v1017_v42, %v2366_v58  ;;  %v1352_v50 = vld [vmem:[#allocation11 + $0xa8] sm:$0xff]  ;;  %v1350_v38 = vld [vmem:[#allocation11 + $0x98] sm:$0xff]  ;;  %v1349_v42 = vld [vmem:[#allocation11 + $0x90] sm:$0xff] }
 0x193   : > { %v1159_v45 = vadd.f32 %v1766_v37, %v1153_v43  ;;  %1408 = vmatpush.msra.mxu1 %v1354_v33  ;;  %v1365_v43 = vld [vmem:[#allocation11 + $0x108] sm:$0xff] }
 0x194   : > { %v1136_v46 = vadd.f32 %v1126_v36, %v1018_v44  ;;  %v1351_v36 = vld [vmem:[#allocation11 + $0xa0] sm:$0xff]  ;;  %v1348_v44 = vld [vmem:[#allocation11 + $0x88] sm:$0xff] }
 0x195   : > { %1163 = vst [vmem:[#allocation3] sm:$0xff] %v1159_v45  ;;  %1409 = vmatpush.msra.mxu1 %v1353_v34  ;;  %v1347_v45 = vld [vmem:[#allocation11 + $0x80] sm:$0xff] }
 0x196   : > { %v1142_v49 = vadd.f32 %v1765_v32, %v1136_v46  ;;  %v1132_v62 = vpop.f32.mrf.mxu0  ;;  %v1444_v46 = vld [vmem:[%s2453_s9 + $0x78] sm:$0xff] }
 0x197   : > { %1410 = vmatpush.msra.mxu1 %v1352_v50  ;;  %1449 = vmatpush.msra.mxu2 %v1444_v46 }
 0x198   : > { %vm1146_vm8 = vcmp.gt.f32.partialorder %v1142_v49, 0.0  ;;  %v1150_v48 = vmul.f32 0.2, %v1142_v49 }
 0x199   : > { %v1020_v52 = vpop.f32.mrf.mxu3  ;;  %1411 = vmatpush.msra.mxu1 %v1351_v36  ;;  %1450 = vmatpush.msra.mxu2 %v1443_v47 }
 0x19a   : > { %v1154_v53 = vsel %vm1146_vm8, %v1142_v49, %v1150_v48  ;;  %v1021_v54 = vadd.f32 %v1020_v52, %v2368_v4  ;;  %v1442_v48 = vld [vmem:[%s2453_s9 + $0x68] sm:$0xff]  ;;  %v1441_v52 = vld [vmem:[%s2453_s9 + $0x60] sm:$0xff] }
 0x19b   : > { %v1160_v55 = vadd.f32 %v1766_v37, %v1154_v53  ;;  %1412 = vmatpush.msra.mxu1 %v1350_v38  ;;  %1451 = vmatpush.msra.mxu2 %v1442_v48 }
 0x19c   : > { %v1137_v56 = vadd.f32 %v1129_v51, %v1021_v54  ;;  %v1767_v54 = vld [vmem:[#allocation10] ss:$0 sm:$0xff] }
 0x19d   : > { %1164 = vst [vmem:[#allocation3 + $0x8] sm:$0xff] %v1160_v55  ;;  %1413 = vmatpush.msra.mxu1 %v1349_v42  ;;  %1452 = vmatpush.msra.mxu2 %v1441_v52 }
 0x19e   : > { %v1143_v57 = vadd.f32 %v1765_v32, %v1137_v56  ;;  %v1440_v56 = vld [vmem:[%s2453_s9 + $0x58] sm:$0xff] }
 0x19f   : > { %1414 = vmatpush.msra.mxu1 %v1348_v44  ;;  %1453 = vmatpush.msra.mxu2 %v1440_v56 }
 0x1a0   : > { %vm1147_vm9 = vcmp.gt.f32.partialorder %v1143_v57, 0.0  ;;  %v1151_v58 = vmul.f32 0.2, %v1143_v57 }
 0x1a1   : > { %v1023_v59 = vpop.f32.mrf.mxu3  ;;  %1415 = vmatpush.msra.mxu1 %v1347_v45 }
 0x1a2   : > { %v1155_v60 = vsel %vm1147_vm9, %v1143_v57, %v1151_v58  ;;  %v1024_v61 = vadd.f32 %v1023_v59, %v2370_v18  ;;  %v1378_v18 = vld [vmem:[#allocation11 + $0x170] sm:$0xff]  ;;  %v1439_v58 = vld [vmem:[%s2453_s9 + $0x50] sm:$0xff] }
 0x1a3   : > { %v1161_v63 = vadd.f32 %v1766_v37, %v1155_v60  ;;  %1381 = vmatpush.msra.mxu0 %v1378_v18  ;;  %1454 = vmatpush.msra.mxu2 %v1439_v58  ;;  %v1432_v18 = vld [vmem:[%s2453_s9 + $0x18] sm:$0xff] }
 0x1a4   : > { %v1138_v0 = vadd.f32 %v1132_v62, %v1024_v61  ;;  %v1171_v1 = vld [vmem:[#allocation3 + $0x1] ss:$2 sm:$0xff]  ;;  %v1167_v2 = vld [vmem:[#allocation3] ss:$2 sm:$0xff]  ;;  %v1768_v61 = vld [vmem:[#allocation10 + $0x1] ss:$0 sm:$0xff] }
 0x1a5   : > { %1165 = vst [vmem:[#allocation3 + $0x10] sm:$0xff] %v1161_v63  ;;  %1224 = vmatmul.f32.vlgmr.msrb.gmra.mxu1 %v1171_v1  ;;  %1247 = vmatmul.f32.vlgmr.msrb.gmra.mxu2 %v1167_v2  ;;  %v1254_v11 = vrot.slane %v1171_v1, 7  ;;  %v1438_v62 = vld [vmem:[%s2453_s9 + $0x48] sm:$0xff]  ;;  %v1437_v1 = vld [vmem:[%s2453_s9 + $0x40] sm:$0xff] }
 0x1a6   : > { %v1144_v3 = vadd.f32 %v1765_v32, %v1138_v0  ;;  %1382 = vmatpush.msra.mxu0 %v1377_v22  ;;  %v1371_v32 = vld [vmem:[#allocation11 + $0x138] sm:$0xff]  ;;  %1455 = vmatpush.msra.mxu2 %v1438_v62 }
 0x1a7   : > { %v1430_v22 = vld [vmem:[%s2453_s9 + $0x8] sm:$0xff] }
 0x1a8   : > { %vm1148_vm10 = vcmp.gt.f32.partialorder %v1144_v3, 0.0  ;;  %v1152_v4 = vmul.f32 0.2, %v1144_v3  ;;  %1383 = vmatpush.msra.mxu0 %v1376_v25  ;;  %1456 = vmatpush.msra.mxu2 %v1437_v1  ;;  %v1769_v25 = vld [vmem:[#allocation13] ss:$0 sm:$0xff] }
 0x1aa   : > { %v1156_v5 = vsel %vm1148_vm10, %v1144_v3, %v1152_v4  ;;  %1384 = vmatpush.msra.mxu0 %v1375_v31 }
 0x1ab   : > { %v1162_v6 = vadd.f32 %v1766_v37, %v1156_v5  ;;  %v1367_v37 = vld [vmem:[#allocation11 + $0x118] sm:$0xff] }
 0x1ac   : > { %1385 = vmatpush.msra.mxu0 %v1374_v20 }
 0x1ad   : > { %1166 = vst [vmem:[#allocation3 + $0x18] sm:$0xff] %v1162_v6  ;;  %v1436_v6 = vld [vmem:[%s2453_s9 + $0x38] sm:$0xff] }
 0x1ae   : > { %1386 = vmatpush.msra.mxu0 %v1373_v27  ;;  %1457 = vmatpush.msra.mxu2 %v1436_v6 }
 0x1b0   : > { %1387 = vmatpush.msra.mxu0 %v1372_v29 }
 0x1b2   : > { %1388 = vmatpush.msra.mxu0 %v1371_v32 }
 0x1b4   : > { %v1173_v8 = vld [vmem:[#allocation3 + $0x11] ss:$2 sm:$0xff]  ;;  %v1169_v9 = vld [vmem:[#allocation3 + $0x10] ss:$2 sm:$0xff]  ;;  %1389 = vmatpush.msra.mxu0 %v1370_v40 }
 0x1b5   : > { %1227 = vmatmul.f32.gmra.mxu1 %v1173_v8  ;;  %v1255_v12 = vrot.slane %v1173_v8, 7  ;;  %1250 = vmatmul.f32.gmra.mxu2 %v1169_v9  ;;  %v1435_v8 = vld [vmem:[%s2453_s9 + $0x30] sm:$0xff] }
 0x1b6   : > { %1390 = vmatpush.msra.mxu0 %v1369_v35  ;;  %1458 = vmatpush.msra.mxu2 %v1435_v8 }
 0x1b7   : > { %v1257_v13 = vsel %vm658_vm0, %v1255_v12, %v1254_v11  ;;  %v1256_v15 = vsel %vm658_vm0, %v1254_v11, %v1255_v12  ;;  %v1434_v11 = vld [vmem:[%s2453_s9 + $0x28] sm:$0xff] }
 0x1b8   : > { %1691 = vmatmul.msk.f32.vlgmr.msra.gmra.mxu3 %vm1700_vm11, %v1257_v13  ;;  %1391 = vmatpush.msra.mxu0 %v1368_v21 }
 0x1b9   : > { %1459 = vmatpush.msra.mxu2 %v1434_v11 }
 0x1ba   : > { %1392 = vmatpush.msra.mxu0 %v1367_v37 }
 0x1bb   : > { %1460 = vmatpush.msra.mxu2 %v1433_v17 }
 0x1bc   : > { %1393 = vmatpush.msra.mxu0 %v1366_v39 }
 0x1bd   : > { %1461 = vmatpush.msra.mxu2 %v1432_v18 }
 0x1be   : > { %1394 = vmatpush.msra.mxu0 %v1365_v43 }
 0x1bf   : > { %1462 = vmatpush.msra.mxu2 %v1431_v19 }
 0x1c0   : > { %1693 = vmatmul.msk.f32.gmra.mxu3 %vm1701_vm12, %v1256_v15  ;;  %1395 = vmatpush.msra.mxu0 %v1364_v41 }
 0x1c1   : > { %1463 = vmatpush.msra.mxu2 %v1430_v22 }
 0x1c3   : > { %1464 = vmatpush.msra.mxu2 %v1429_v23 }
 0x222   : > { %v1225_v51 = vpop.f32.mrf.mxu1 }
 0x228   : > { %v1248_v49 = vpop.f32.mrf.mxu2 }
 0x229   : > { %v1249_v53 = vadd.f32 %v1248_v49, %v1225_v51 }
 0x232   : > { %v1228_v0 = vpop.f32.mrf.mxu1 }
 0x238   : > { %v1251_v60 = vpop.f32.mrf.mxu2 }
 0x239   : > { %v1252_v2 = vadd.f32 %v1251_v60, %v1228_v0 }
 0x23b   : > { %v1319_v55 = vpop.f32.mrf.mxu3 }
 0x23c   : > { %v1325_v57 = vadd.f32 %v1319_v55, %v1249_v53 }
 0x23e   : > { %v1329_v59 = vadd.f32 %v1767_v54, %v1325_v57 }
 0x240   : > { %vm1331_vm0 = vcmp.gt.f32.partialorder %v1329_v59, 0.0  ;;  %v1333_v63 = vmul.f32 0.2, %v1329_v59 }
 0x242   : > { %v1335_v3 = vsel %vm1331_vm0, %v1329_v59, %v1333_v63 }
 0x243   : > { %v1339_v4 = vadd.f32 %v1768_v61, %v1335_v3  ;;  %v1322_v5 = vpop.f32.mrf.mxu3 }
 0x244   : > { %v1326_v7 = vadd.f32 %v1322_v5, %v1252_v2 }
 0x245   : > { %1341 = vst [vmem:[#allocation4] sm:$0xff] %v1339_v4 }
 0x246   : > { %v1330_v9 = vadd.f32 %v1767_v54, %v1326_v7 }
 0x248   : > { %vm1332_vm13 = vcmp.gt.f32.partialorder %v1330_v9, 0.0  ;;  %v1334_v12 = vmul.f32 0.2, %v1330_v9 }
 0x24a   : > { %v1336_v13 = vsel %vm1332_vm13, %v1330_v9, %v1334_v12 }
 0x24b   : > { %v1340_v14 = vadd.f32 %v1768_v61, %v1336_v13 }
 0x24d   : > { %1342 = vst [vmem:[#allocation4 + $0x8] sm:$0xff] %v1340_v14 }
 0x254   : > { %v1345_v15 = vld [vmem:[#allocation4 + $0x1] ss:$2 sm:$0xff]  ;;  %v1343_v16 = vld [vmem:[#allocation4] ss:$2 sm:$0xff] }
 0x255   : > { %1396 = vmatmul.f32.vlgmr.msra.gmra.mxu0 %v1345_v15  ;;  %1416 = vmatmul.f32.vlgmr.msra.gmra.mxu1 %v1343_v16 }
 0x2d2   : > { %v1397_v24 = vpop.f32.mrf.mxu0  ;;  %v1417_v31 = vpop.f32.mrf.mxu1 }
 0x2d3   : > { %v1418_v10 = vadd.f32 %v1417_v31, %v1397_v24 }
 0x2d5   : > { %v1422_v20 = vadd.f32 %v1769_v25, %v1418_v10 }
 0x2d7   : > { %vm1423_vm14 = vcmp.gt.f32.partialorder %v1422_v20, 0.0  ;;  %v1424_v27 = vmul.f32 0.2, %v1422_v20 }
 0x2d9   : > { %v1425_v28 = vsel %vm1423_vm14, %v1422_v20, %v1424_v27 }
 0x2da   : > { %v1428_v29 = vadd.f32 %v1770_v26, %v1425_v28 }
 0x2dc   : > { %1465 = vmatmul.f32.vlgmr.msra.gmra.mxu2 %v1428_v29 }
 0x35f   : > { %v1466_v32 = vpop.f32.mrf.mxu2 }
 0x360   : > { %v1467_v33 = vadd.f32 %v1771_v30, %v1466_v32 }
 0x362   : > { %v1469_v40 = vsub.f32 0.0, %v1467_v33 }
 0x364   : > { %v1470_v34 = vmul.f32 1.442695, %v1469_v40 }
 0x366   : > { %1772 = vpow2.f32 %v1470_v34 }
 0x36c   : > { %v1773_v35 = vpop.eup %1772 }
 0x36d   : > { %v1472_v50 = vadd.f32 1.0, %v1773_v35 }
 0x36f   : > { %1774 = vrcp.f32 %v1472_v50  ;;  %v1484_v38 = vand.u32 2147483648, %v1472_v50  ;;  %v1482_v42 = vand.u32 2147483647, %v1472_v50  ;;  %vm1478_vm1 = vweird.f32 %v1472_v50 }
 0x371   : > { %v1485_v44 = vor.u32 1.1754944e-38, %v1484_v38  ;;  %vm1483_vm4 = vcmp.eq.f32.partialorder %v1482_v42, 8.507059e+37 }
 0x375   : > { %v1775_v21 = vpop.eup %1774 }
 0x376   : > { %v1474_v36 = vmul.f32 %v1775_v21, %v1472_v50  ;;  %vm1479_vm15 = vweird.f32 %v1775_v21 }
 0x377   : > { %vm1480_vm2 = vmor %vm1478_vm1, %vm1479_vm15 }
 0x378   : > { %v1475_v37 = vsub.f32 1.0, %v1474_v36 }
 0x37a   : > { %v1476_v39 = vmul.f32 %v1775_v21, %v1475_v37 }
 0x37c   : > { %v1477_v43 = vadd.f32 %v1775_v21, %v1476_v39 }
 0x37e   : > { %v1481_v41 = vsel %vm1480_vm2, %v1775_v21, %v1477_v43 }
 0x37f   : > { %v1486_v45 = vsel %vm1483_vm4, %v1485_v44, %v1481_v41 }
 0x380   : > { %1489 = vst.msk [vmem:[%s467_s23] sm:$0xff] %vm1488_vm3, %v1486_v45 }
 0x381 PF: > { %s26_s19 = sadd.s32 1, %s1944_s19  }
 0x382   : > { %p23_p8 = scmp.ge.s32.totalorder %s26_s19, 4  }
 0x384   :  { %25 = sbr.rel (!%p23_p8) target bundleno = 6 (0x6), region = 149 }
 0x389   :  { %1509 = vsyncpa [#allocation7], 1 }
 0x38a   :  { %1511 = vsyncpa [#allocation7 + $0x1], 1 }
 0x38b   :  { %1512 = vsyncpa [#allocation9], 1 }
 0x38c   :  { %1513 = vsyncpa [#allocation12], 1 }

</bundles_post_ra>
